<compile_context>
chip_gen: v6e
topology: v6e:2x2x1
jax: 0.10.0
libtpu: 0.0.40
codegen_flags: <defaults>
</compile_context>

<pallas_src>
import functools

import jax
import jax.numpy as jnp
from jax import lax
from jax.experimental import pallas as pl
from jax.experimental.pallas import tpu as pltpu

DEG_VOCAB, COL_VOCAB, FIX_VOCAB = 512, 1024, 2
E_DEG, E_COL, E_FIX = 8, 8, 2
IN_DIM = E_DEG + E_COL + E_FIX          # 18
HIDDEN = 32


def _round_up(x, m):
    return ((x + m - 1) // m) * m


def mlp_score_kernel(ids_ref, mtd_ref, mtc_ref, fix0_ref, fix1_ref, b1_ref,
                     w2_ref, b2_ref, out_ref):
    """One tile of vertices, transposed (lane-dense) layout.

    ids        : (3, tile) int32   rows = [deg, col, fixed]
    mtd        : (HIDDEN, 512)  f32   (emb_deg @ W1[:8]).T
    mtc        : (HIDDEN, 1024) f32   (emb_col @ W1[8:16]).T
    fix0, fix1 : (HIDDEN, 1) f32      emb_fix[k] @ W1[16:18] + b1   (b1 folded)
    b1         : (HIDDEN, 1) f32      used only for out-of-range `fixed`
    w2         : (HIDDEN, 1) f32
    b2         : (1, 1) f32
    out        : (1, tile) f32
    """
    tile = ids_ref.shape[1]

    # clip(max=...) exactly as in the torch module (only the max is clipped);
    # negative ids simply miss every row of their segment -> zero embedding.
    deg = jnp.minimum(ids_ref[0:1, :], DEG_VOCAB - 1)        # (1, tile)
    col = jnp.minimum(ids_ref[1:2, :], COL_VOCAB - 1)        # (1, tile)
    fix = ids_ref[2:3, :]                                    # (1, tile)

    # Segmented one-hots with range-local iotas (rows = vocab, cols = verts).
    iota_d = lax.broadcasted_iota(jnp.int32, (DEG_VOCAB, tile), 0)
    oh_d = (iota_d == deg).astype(jnp.float32)               # (512, tile)
    iota_c = lax.broadcasted_iota(jnp.int32, (COL_VOCAB, tile), 0)
    oh_c = (iota_c == col).astype(jnp.float32)               # (1024, tile)

    # First layer: h^T = Mdeg^T @ oh_d + Mcol^T @ oh_c + fixed/bias (VPU select).
    h = jnp.dot(mtd_ref[...], oh_d, preferred_element_type=jnp.float32)
    h = h + jnp.dot(mtc_ref[...], oh_c, preferred_element_type=jnp.float32)
    h = h + jnp.where(fix == 0, fix0_ref[...],
                      jnp.where(fix == 1, fix1_ref[...], b1_ref[...]))
    h = jnp.maximum(h, 0.0)                                  # ReLU, (HIDDEN, tile)

    # Second layer (hidden -> 1): VPU multiply + sublane reduce; lane-dense store.
    out_ref[...] = jnp.sum(h * w2_ref[...], axis=0, keepdims=True) + b2_ref[...]


def _fold_params(params):
    """Fold the embedding tables into the first linear layer (host side, f32)."""
    w1 = params["w1"].astype(jnp.float32)                           # (18, 32)
    b1 = params["b1"].reshape(-1, 1).astype(jnp.float32)            # (32, 1)
    mtd = (params["emb_deg"].astype(jnp.float32) @ w1[0:E_DEG]).T   # (32, 512)
    mtc = (params["emb_col"].astype(jnp.float32)
           @ w1[E_DEG:E_DEG + E_COL]).T                             # (32, 1024)
    fx = (params["emb_fix"].astype(jnp.float32)
          @ w1[E_DEG + E_COL:IN_DIM]).T                             # (32, 2)
    fix0 = fx[:, 0:1] + b1                                          # (32, 1)
    fix1 = fx[:, 1:2] + b1                                          # (32, 1)
    w2 = params["w2"].reshape(-1, 1).astype(jnp.float32)            # (32, 1)
    b2 = params["b2"].reshape(1, 1).astype(jnp.float32)             # (1, 1)
    return mtd, mtc, fix0, fix1, b1, w2, b2


@functools.partial(jax.jit, static_argnames=("tile_n",))
def mlp_score(deg, col, fixed, params, *, tile_n=1024):
    """Pallas equivalent of MLPScore.forward(deg, col, fixed) for 1-D id vectors."""
    n = deg.shape[0]
    tile = min(tile_n, _round_up(max(n, 1), 128))
    n_pad = _round_up(n, tile)

    ids = jnp.stack([deg, col, fixed]).astype(jnp.int32)      # (3, n)
    ids = jnp.pad(ids, ((0, 0), (0, n_pad - n)))              # pad with valid id 0

    mtd, mtc, fix0, fix1, b1, w2, b2 = _fold_params(params)

    id_spec = pl.BlockSpec((3, tile), lambda i: (0, i))
    full = lambda a: pl.BlockSpec(a.shape, lambda i: (0, 0))

    # TODO(synk): on v7x, confirm in a trace that the "parallel" vertex axis
    # actually shards across both TensorCores; otherwise switch to core_map.
    out = pl.pallas_call(
        mlp_score_kernel,
        out_shape=jax.ShapeDtypeStruct((1, n_pad), jnp.float32),
        grid=(n_pad // tile,),
        in_specs=[id_spec,
                  full(mtd), full(mtc), full(fix0), full(fix1),
                  full(b1), full(w2), full(b2)],
        out_specs=pl.BlockSpec((1, tile), lambda i: (0, i)),
        compiler_params=pltpu.CompilerParams(
            dimension_semantics=("parallel",),
            vmem_limit_bytes=32 * 1024 * 1024),
    )(ids, mtd, mtc, fix0, fix1, b1, w2, b2)

    return out[0, :n]                                         # .squeeze(-1) of (n, 1)


def init_params(key, hidden=HIDDEN):
    ks = jax.random.split(key, 7)
    # nn.Embedding ~ N(0,1); nn.Linear ~ U(-1/sqrt(fan_in), 1/sqrt(fan_in))
    emb_deg = jax.random.normal(ks[0], (DEG_VOCAB, E_DEG), jnp.float32)
    emb_col = jax.random.normal(ks[1], (COL_VOCAB, E_COL), jnp.float32)
    emb_fix = jax.random.normal(ks[2], (FIX_VOCAB, E_FIX), jnp.float32)
    lim1 = 1.0 / jnp.sqrt(IN_DIM)
    w1 = jax.random.uniform(ks[3], (IN_DIM, hidden), jnp.float32, -lim1, lim1)
    b1 = jax.random.uniform(ks[4], (1, hidden), jnp.float32, -lim1, lim1)
    lim2 = 1.0 / jnp.sqrt(hidden)
    w2 = jax.random.uniform(ks[5], (hidden, 1), jnp.float32, -lim2, lim2)
    b2 = jax.random.uniform(ks[6], (1, 1), jnp.float32, -lim2, lim2)
    return dict(emb_deg=emb_deg, emb_col=emb_col, emb_fix=emb_fix,
                w1=w1, b1=b1, w2=w2, b2=b2)


def mlp_score_ref(deg, col, fixed, p):
    """Pure-JAX (f32) reference mirroring the PyTorch forward."""
    z = jnp.concatenate(
        [p["emb_deg"][jnp.minimum(deg, DEG_VOCAB - 1)],
         p["emb_col"][jnp.minimum(col, COL_VOCAB - 1)],
         p["emb_fix"][fixed]], axis=-1)
    h = jax.nn.relu(z @ p["w1"] + p["b1"][0])
    return (h @ p["w2"] + p["b2"][0])[..., 0]


if __name__ == "__main__":
    key = jax.random.PRNGKey(0)
    kp, kd, kc, kf = jax.random.split(key, 4)
    params = init_params(kp)

    # Small demo batch; ids deliberately exceed the vocab maxima to exercise
    # the clip(max=...) path.
    N = 8
    deg = jax.random.randint(kd, (N,), 0, 700, dtype=jnp.int32)
    col = jax.random.randint(kc, (N,), 0, 1300, dtype=jnp.int32)
    fixed = jax.random.randint(kf, (N,), 0, 2, dtype=jnp.int32)

    out = jax.block_until_ready(mlp_score(deg, col, fixed, params))
    ref = mlp_score_ref(deg, col, fixed, params)
    assert out.shape == (N,)
    # All-f32 path => tight tolerance vs. the f32 module math.
    assert jnp.allclose(out, ref, atol=1e-3, rtol=1e-3), (out, ref)

    # Larger batch exercising the multi-tile "parallel" grid path.
    N2 = 2500
    kd2, kc2, kf2 = jax.random.split(jax.random.PRNGKey(1), 3)
    deg2 = jax.random.randint(kd2, (N2,), 0, 700, dtype=jnp.int32)
    col2 = jax.random.randint(kc2, (N2,), 0, 1300, dtype=jnp.int32)
    fix2 = jax.random.randint(kf2, (N2,), 0, 2, dtype=jnp.int32)
    out2 = jax.block_until_ready(mlp_score(deg2, col2, fix2, params))
    ref2 = mlp_score_ref(deg2, col2, fix2, params)
    assert out2.shape == (N2,)
    assert jnp.allclose(out2, ref2, atol=1e-3, rtol=1e-3)

    print("KERNEL_OK")
</pallas_src>

<mosaic_0001>
module attributes {stable_mosaic.version = 11 : i64} {
  func.func @mlp_score_kernel(%arg0: i32, %arg1: memref<3x128xi32, #tpu.memory_space<vmem>>, %arg2: memref<32x512xf32, #tpu.memory_space<vmem>>, %arg3: memref<32x1024xf32, #tpu.memory_space<vmem>>, %arg4: memref<32x1xf32, #tpu.memory_space<vmem>>, %arg5: memref<32x1xf32, #tpu.memory_space<vmem>>, %arg6: memref<32x1xf32, #tpu.memory_space<vmem>>, %arg7: memref<32x1xf32, #tpu.memory_space<vmem>>, %arg8: memref<1x1xf32, #tpu.memory_space<vmem>>, %arg9: memref<1x128xf32, #tpu.memory_space<vmem>>) attributes {dimension_semantics = [#tpu.dimension_semantics<parallel>], iteration_bounds = array<i64: 1>, scalar_prefetch = 0 : i64, scratch_operands = 0 : i64, tpu.core_type = #tpu.core_type<tc>, window_params = [{transform_indices = @transform_0, window_bounds = array<i64: 3, 128>}, {pipeline_mode = #tpu.pipeline_mode<synchronous>, transform_indices = @transform_1, window_bounds = array<i64: 32, 512>}, {pipeline_mode = #tpu.pipeline_mode<synchronous>, transform_indices = @transform_2, window_bounds = array<i64: 32, 1024>}, {pipeline_mode = #tpu.pipeline_mode<synchronous>, transform_indices = @transform_3, window_bounds = array<i64: 32, 1>}, {pipeline_mode = #tpu.pipeline_mode<synchronous>, transform_indices = @transform_4, window_bounds = array<i64: 32, 1>}, {pipeline_mode = #tpu.pipeline_mode<synchronous>, transform_indices = @transform_5, window_bounds = array<i64: 32, 1>}, {pipeline_mode = #tpu.pipeline_mode<synchronous>, transform_indices = @transform_6, window_bounds = array<i64: 32, 1>}, {pipeline_mode = #tpu.pipeline_mode<synchronous>, transform_indices = @transform_7, window_bounds = array<i64: 1, 1>}, {transform_indices = @transform_8, window_bounds = array<i64: 1, 128>}]} {
    %c0 = arith.constant 0 : index
    %c0_0 = arith.constant 0 : index
    %0 = vector.load %arg1[%c0, %c0_0] : memref<3x128xi32, #tpu.memory_space<vmem>>, vector<1x128xi32>
    %c511_i32 = arith.constant 511 : i32
    %1 = vector.broadcast %c511_i32 : i32 to vector<1x128xi32>
    %2 = arith.minsi %0, %1 : vector<1x128xi32>
    %c1 = arith.constant 1 : index
    %c0_1 = arith.constant 0 : index
    %3 = vector.load %arg1[%c1, %c0_1] : memref<3x128xi32, #tpu.memory_space<vmem>>, vector<1x128xi32>
    %c1023_i32 = arith.constant 1023 : i32
    %4 = vector.broadcast %c1023_i32 : i32 to vector<1x128xi32>
    %5 = arith.minsi %3, %4 : vector<1x128xi32>
    %c2 = arith.constant 2 : index
    %c0_2 = arith.constant 0 : index
    %6 = vector.load %arg1[%c2, %c0_2] : memref<3x128xi32, #tpu.memory_space<vmem>>, vector<1x128xi32>
    %7 = tpu.iota {dimensions = array<i32: 0>} : vector<512x128xi32>
    %8 = vector.broadcast %2 : vector<1x128xi32> to vector<512x128xi32>
    %9 = arith.cmpi eq, %7, %8 : vector<512x128xi32>
    %10 = arith.extui %9 : vector<512x128xi1> to vector<512x128xi32>
    %11 = arith.sitofp %10 : vector<512x128xi32> to vector<512x128xf32>
    %12 = tpu.iota {dimensions = array<i32: 0>} : vector<1024x128xi32>
    %13 = vector.broadcast %5 : vector<1x128xi32> to vector<1024x128xi32>
    %14 = arith.cmpi eq, %12, %13 : vector<1024x128xi32>
    %15 = arith.extui %14 : vector<1024x128xi1> to vector<1024x128xi32>
    %16 = arith.sitofp %15 : vector<1024x128xi32> to vector<1024x128xf32>
    %c0_3 = arith.constant 0 : index
    %c0_4 = arith.constant 0 : index
    %17 = vector.load %arg2[%c0_3, %c0_4] : memref<32x512xf32, #tpu.memory_space<vmem>>, vector<32x512xf32>
    %cst = arith.constant dense<0.000000e+00> : vector<32x128xf32>
    %18 = tpu.matmul %17, %11, %cst {dimension_numbers = #tpu.dot_dimension_numbers<[1], [0], [0], [1], [0, 0, 1, 1], [], []>} : vector<32x512xf32>, vector<512x128xf32>, vector<32x128xf32> -> vector<32x128xf32>
    %c0_5 = arith.constant 0 : index
    %c0_6 = arith.constant 0 : index
    %19 = vector.load %arg3[%c0_5, %c0_6] : memref<32x1024xf32, #tpu.memory_space<vmem>>, vector<32x1024xf32>
    %cst_7 = arith.constant dense<0.000000e+00> : vector<32x128xf32>
    %20 = tpu.matmul %19, %16, %cst_7 {dimension_numbers = #tpu.dot_dimension_numbers<[1], [0], [0], [1], [0, 0, 1, 1], [], []>} : vector<32x1024xf32>, vector<1024x128xf32>, vector<32x128xf32> -> vector<32x128xf32>
    %21 = arith.addf %18, %20 : vector<32x128xf32>
    %c0_i32 = arith.constant 0 : i32
    %22 = vector.broadcast %c0_i32 : i32 to vector<1x128xi32>
    %23 = arith.cmpi eq, %6, %22 : vector<1x128xi32>
    %c0_8 = arith.constant 0 : index
    %c0_9 = arith.constant 0 : index
    %24 = vector.load %arg4[%c0_8, %c0_9] : memref<32x1xf32, #tpu.memory_space<vmem>>, vector<32x1xf32>
    %c1_i32 = arith.constant 1 : i32
    %25 = vector.broadcast %c1_i32 : i32 to vector<1x128xi32>
    %26 = arith.cmpi eq, %6, %25 : vector<1x128xi32>
    %c0_10 = arith.constant 0 : index
    %c0_11 = arith.constant 0 : index
    %27 = vector.load %arg5[%c0_10, %c0_11] : memref<32x1xf32, #tpu.memory_space<vmem>>, vector<32x1xf32>
    %c0_12 = arith.constant 0 : index
    %c0_13 = arith.constant 0 : index
    %28 = vector.load %arg6[%c0_12, %c0_13] : memref<32x1xf32, #tpu.memory_space<vmem>>, vector<32x1xf32>
    %29 = vector.shape_cast %26 : vector<1x128xi1> to vector<1x128xi1>
    %30 = vector.broadcast %29 : vector<1x128xi1> to vector<32x128xi1>
    %31 = vector.shape_cast %27 : vector<32x1xf32> to vector<32x1xf32>
    %32 = vector.broadcast %31 : vector<32x1xf32> to vector<32x128xf32>
    %33 = vector.shape_cast %28 : vector<32x1xf32> to vector<32x1xf32>
    %34 = vector.broadcast %33 : vector<32x1xf32> to vector<32x128xf32>
    %35 = arith.select %30, %32, %34 : vector<32x128xi1>, vector<32x128xf32>
    %36 = vector.shape_cast %23 : vector<1x128xi1> to vector<1x128xi1>
    %37 = vector.broadcast %36 : vector<1x128xi1> to vector<32x128xi1>
    %38 = vector.shape_cast %24 : vector<32x1xf32> to vector<32x1xf32>
    %39 = vector.broadcast %38 : vector<32x1xf32> to vector<32x128xf32>
    %40 = arith.select %37, %39, %35 : vector<32x128xi1>, vector<32x128xf32>
    %41 = arith.addf %21, %40 : vector<32x128xf32>
    %cst_14 = arith.constant 0.000000e+00 : f32
    %42 = vector.broadcast %cst_14 : f32 to vector<32x128xf32>
    %43 = arith.maximumf %41, %42 : vector<32x128xf32>
    %c0_15 = arith.constant 0 : index
    %c0_16 = arith.constant 0 : index
    %44 = vector.load %arg7[%c0_15, %c0_16] : memref<32x1xf32, #tpu.memory_space<vmem>>, vector<32x1xf32>
    %45 = vector.broadcast %44 : vector<32x1xf32> to vector<32x128xf32>
    %46 = arith.mulf %43, %45 : vector<32x128xf32>
    %cst_17 = arith.constant dense<0.000000e+00> : vector<128xf32>
    %47 = vector.multi_reduction <add>, %46, %cst_17 [0] : vector<32x128xf32> to vector<128xf32>
    %48 = vector.shape_cast %47 : vector<128xf32> to vector<1x128xf32>
    %c0_18 = arith.constant 0 : index
    %c0_19 = arith.constant 0 : index
    %49 = vector.load %arg8[%c0_18, %c0_19] : memref<1x1xf32, #tpu.memory_space<vmem>>, vector<1x1xf32>
    %50 = vector.broadcast %49 : vector<1x1xf32> to vector<1x128xf32>
    %51 = arith.addf %48, %50 : vector<1x128xf32>
    %c0_20 = arith.constant 0 : index
    %c0_21 = arith.constant 0 : index
    %52 = vector.load %arg9[%c0_20, %c0_21] : memref<1x128xf32, #tpu.memory_space<vmem>>, vector<1x128xf32>
    tpu.vector_store %arg9[%c0_20, %c0_21], %51 {strides = array<i32>} : memref<1x128xf32, #tpu.memory_space<vmem>>, vector<1x128xf32>,
    return
  }
  func.func @transform_0(%arg0: i32) -> (i32, i32) {
    %c0_i32 = arith.constant 0 : i32
    %c0_i32_0 = arith.constant 0 : i32
    return %c0_i32, %arg0 : i32, i32
  }
  func.func @transform_1(%arg0: i32) -> (i32, i32) {
    %c0_i32 = arith.constant 0 : i32
    %c0_i32_0 = arith.constant 0 : i32
    %c0_i32_1 = arith.constant 0 : i32
    return %c0_i32, %c0_i32_0 : i32, i32
  }
  func.func @transform_2(%arg0: i32) -> (i32, i32) {
    %c0_i32 = arith.constant 0 : i32
    %c0_i32_0 = arith.constant 0 : i32
    %c0_i32_1 = arith.constant 0 : i32
    return %c0_i32, %c0_i32_0 : i32, i32
  }
  func.func @transform_3(%arg0: i32) -> (i32, i32) {
    %c0_i32 = arith.constant 0 : i32
    %c0_i32_0 = arith.constant 0 : i32
    %c0_i32_1 = arith.constant 0 : i32
    return %c0_i32, %c0_i32_0 : i32, i32
  }
  func.func @transform_4(%arg0: i32) -> (i32, i32) {
    %c0_i32 = arith.constant 0 : i32
    %c0_i32_0 = arith.constant 0 : i32
    %c0_i32_1 = arith.constant 0 : i32
    return %c0_i32, %c0_i32_0 : i32, i32
  }
  func.func @transform_5(%arg0: i32) -> (i32, i32) {
    %c0_i32 = arith.constant 0 : i32
    %c0_i32_0 = arith.constant 0 : i32
    %c0_i32_1 = arith.constant 0 : i32
    return %c0_i32, %c0_i32_0 : i32, i32
  }
  func.func @transform_6(%arg0: i32) -> (i32, i32) {
    %c0_i32 = arith.constant 0 : i32
    %c0_i32_0 = arith.constant 0 : i32
    %c0_i32_1 = arith.constant 0 : i32
    return %c0_i32, %c0_i32_0 : i32, i32
  }
  func.func @transform_7(%arg0: i32) -> (i32, i32) {
    %c0_i32 = arith.constant 0 : i32
    %c0_i32_0 = arith.constant 0 : i32
    %c0_i32_1 = arith.constant 0 : i32
    return %c0_i32, %c0_i32_0 : i32, i32
  }
  func.func @transform_8(%arg0: i32) -> (i32, i32) {
    %c0_i32 = arith.constant 0 : i32
    %c0_i32_0 = arith.constant 0 : i32
    return %c0_i32, %arg0 : i32, i32
  }
}

</mosaic_0001>

<bundles_post_ra>
// kernel: mlp_score.1
= control target key start
LH: loop header
LB: loop body
LE: loop exit
PB: predicated region body
PF: predicated region fallthrough
CT: control target
= control target key end

     0   :  { %v38_v0 = vlaneseq  ;;  %v2116_v22 = vmov 1.0   ;;  %s3426_s0 = inlined_call_operand.vmem [shape: s32[3,128], index: 0, kind: input, shape index: {}]   ;;  %s3427_s2 = inlined_call_operand.vmem [shape: f32[32,1024], index: 2, kind: input, shape index: {}]   ;;  %s3428_s7 = inlined_call_operand.<no memory space> [shape: f32[1,1], index: 7, kind: input, shape index: {}]   ;;  %s3429_s1 = inlined_call_operand.vmem [shape: f32[32,512], index: 1, kind: input, shape index: {}]   ;;  %s3430_s4 = inlined_call_operand.vmem [shape: f32[32,1], index: 4, kind: input, shape index: {}]   ;;  %s3431_s5 = inlined_call_operand.vmem [shape: f32[32,1], index: 5, kind: input, shape index: {}]   ;;  %s3432_s3 = inlined_call_operand.vmem [shape: f32[32,1], index: 3, kind: input, shape index: {}]   ;;  %s3433_s6 = inlined_call_operand.vmem [shape: f32[32,1], index: 6, kind: input, shape index: {}]   ;;  %s3434_s8 = inlined_call_operand.vmem [shape: f32[1,128], index: 8, kind: output, shape index: {}]  }
   0x1   :  { %v34_v1 = vld [vmem:[%s3426_s0 + $0x1] sm:$0x1]  ;;  %v768_v2 = vld [vmem:[%s3427_s2 + $0x8] sm:$0xff]  ;;  %v770_v3 = vld [vmem:[%s3427_s2 + $0x18] sm:$0xff] }
   0x2   :  { %vm35_vm0 = vcmp.lt.s32.totalorder %v34_v1, 1023  ;;  %v2172_v4 = vshrl.u32 %v38_v0, 7  ;;  %863 = vmatprep.mubr.f32.mxu0 %v768_v2  ;;  %948 = vmatprep.mubr.f32.mxu1 %v770_v3 }
   0x3   :  { %v36_v5 = vsel %vm35_vm0, %v34_v1, 1023 }
   0x4   :  { %v2175_v6 = vadd.s32 248, %v2172_v4  ;;  %v2178_v7 = vsub.s32 0, %v2172_v4  ;;  %v2181_v8 = vadd.s32 504, %v2172_v4  ;;  %v2184_v9 = vadd.s32 120, %v2172_v4 }
   0x5   :  { %v2187_v10 = vadd.s32 376, %v2172_v4  ;;  %v2190_v11 = vadd.s32 240, %v2172_v4  ;;  %v2193_v12 = vadd.s32 496, %v2172_v4  ;;  %v2196_v13 = vadd.s32 112, %v2172_v4 }
   0x6   :  { %v2199_v14 = vrot.slane %v36_v5, %v2178_v7  ;;  %v2202_v15 = vadd.s32 368, %v2172_v4  ;;  %v2205_v16 = vadd.s32 232, %v2172_v4  ;;  %v2208_v17 = vadd.s32 488, %v2172_v4 }
   0x7   :  { %v2211_v18 = vadd.s32 104, %v2172_v4  ;;  %v2214_v19 = vadd.s32 360, %v2172_v4  ;;  %v2217_v20 = vadd.s32 224, %v2172_v4  ;;  %v2220_v21 = vadd.s32 480, %v2172_v4 }
   0x8   :  { %vm398_vm1 = vcmp.eq.s32.totalorder %v2175_v6, %v2199_v14  ;;  %vm430_vm2 = vcmp.eq.s32.totalorder %v2181_v8, %v2199_v14  ;;  %vm382_vm3 = vcmp.eq.s32.totalorder %v2184_v9, %v2199_v14  ;;  %vm414_vm4 = vcmp.eq.s32.totalorder %v2187_v10, %v2199_v14 }
   0x9   :  { %1848 = vmatprep.subr.msk.mxu0 %vm398_vm1, %v2116_v22  ;;  %1892 = vmatprep.subr.msk.mxu1 %vm430_vm2, %v2116_v22  ;;  %vm397_vm5 = vcmp.eq.s32.totalorder %v2190_v11, %v2199_v14  ;;  %vm429_vm6 = vcmp.eq.s32.totalorder %v2193_v12, %v2199_v14  ;;  %vm381_vm7 = vcmp.eq.s32.totalorder %v2196_v13, %v2199_v14  ;;  %v2239_v23 = vadd.s32 96, %v2172_v4 }
   0xa   :  { %1849 = vmatpush3.msk.msra.mxu0 %vm382_vm3, %v2116_v22  ;;  %1893 = vmatpush3.msk.msra.mxu1 %vm414_vm4, %v2116_v22  ;;  %vm413_vm8 = vcmp.eq.s32.totalorder %v2202_v15, %v2199_v14  ;;  %vm396_vm9 = vcmp.eq.s32.totalorder %v2205_v16, %v2199_v14  ;;  %vm428_vm10 = vcmp.eq.s32.totalorder %v2208_v17, %v2199_v14  ;;  %v2250_v24 = vadd.s32 352, %v2172_v4 }
   0xb   :  { %1850 = vmatprep.subr.msk.mxu0 %vm397_vm5, %v2116_v22  ;;  %1894 = vmatprep.subr.msk.mxu1 %vm429_vm6, %v2116_v22  ;;  %vm380_vm11 = vcmp.eq.s32.totalorder %v2211_v18, %v2199_v14  ;;  %vm412_vm12 = vcmp.eq.s32.totalorder %v2214_v19, %v2199_v14  ;;  %vm395_vm13 = vcmp.eq.s32.totalorder %v2217_v20, %v2199_v14  ;;  %v2261_v25 = vadd.s32 216, %v2172_v4 }
   0xc   :  { %1851 = vmatpush3.msk.msra.mxu0 %vm381_vm7, %v2116_v22  ;;  %1895 = vmatpush3.msk.msra.mxu1 %vm413_vm8, %v2116_v22  ;;  %vm427_vm14 = vcmp.eq.s32.totalorder %v2220_v21, %v2199_v14  ;;  %vm379_vm15 = vcmp.eq.s32.totalorder %v2239_v23, %v2199_v14  ;;  %vm411_vm0 = vcmp.eq.s32.totalorder %v2250_v24, %v2199_v14  ;;  %v2272_v26 = vadd.s32 472, %v2172_v4 }
   0xd   :  { %1852 = vmatprep.subr.msk.mxu0 %vm396_vm9, %v2116_v22  ;;  %1896 = vmatprep.subr.msk.mxu1 %vm428_vm10, %v2116_v22  ;;  %vm394_vm1 = vcmp.eq.s32.totalorder %v2261_v25, %v2199_v14  ;;  %v2279_v27 = vadd.s32 88, %v2172_v4  ;;  %v2282_v28 = vadd.s32 344, %v2172_v4  ;;  %v2285_v29 = vadd.s32 208, %v2172_v4 }
   0xe   :  { %1853 = vmatpush3.msk.msra.mxu0 %vm380_vm11, %v2116_v22  ;;  %1897 = vmatpush3.msk.msra.mxu1 %vm412_vm12, %v2116_v22  ;;  %vm426_vm2 = vcmp.eq.s32.totalorder %v2272_v26, %v2199_v14  ;;  %v2298_v30 = vadd.s32 464, %v2172_v4  ;;  %v2301_v31 = vadd.s32 80, %v2172_v4  ;;  %v2304_v32 = vadd.s32 336, %v2172_v4 }
   0xf   :  { %1854 = vmatprep.subr.msk.mxu0 %vm395_vm13, %v2116_v22  ;;  %1898 = vmatprep.subr.msk.mxu1 %vm427_vm14, %v2116_v22  ;;  %vm378_vm3 = vcmp.eq.s32.totalorder %v2279_v27, %v2199_v14  ;;  %vm410_vm4 = vcmp.eq.s32.totalorder %v2282_v28, %v2199_v14  ;;  %vm393_vm5 = vcmp.eq.s32.totalorder %v2285_v29, %v2199_v14  ;;  %v2321_v33 = vadd.s32 200, %v2172_v4 }
  0x10   :  { %1855 = vmatpush3.msk.msra.mxu0 %vm379_vm15, %v2116_v22  ;;  %1899 = vmatpush3.msk.msra.mxu1 %vm411_vm0, %v2116_v22  ;;  %vm425_vm6 = vcmp.eq.s32.totalorder %v2298_v30, %v2199_v14  ;;  %vm377_vm7 = vcmp.eq.s32.totalorder %v2301_v31, %v2199_v14  ;;  %vm409_vm8 = vcmp.eq.s32.totalorder %v2304_v32, %v2199_v14  ;;  %v2338_v34 = vadd.s32 456, %v2172_v4 }
  0x11   :  { %1856 = vmatprep.subr.msk.mxu0 %vm394_vm1, %v2116_v22  ;;  %1900 = vmatprep.subr.msk.mxu1 %vm426_vm2, %v2116_v22  ;;  %vm392_vm9 = vcmp.eq.s32.totalorder %v2321_v33, %v2199_v14  ;;  %v2351_v35 = vadd.s32 72, %v2172_v4  ;;  %v2354_v36 = vadd.s32 328, %v2172_v4  ;;  %v2357_v37 = vadd.s32 192, %v2172_v4 }
  0x12   :  { %1857 = vmatpush3.msk.msra.mxu0 %vm378_vm3, %v2116_v22  ;;  %1901 = vmatpush3.msk.msra.mxu1 %vm410_vm4, %v2116_v22  ;;  %vm424_vm10 = vcmp.eq.s32.totalorder %v2338_v34, %v2199_v14  ;;  %v2370_v38 = vadd.s32 448, %v2172_v4  ;;  %v2373_v39 = vadd.s32 64, %v2172_v4  ;;  %v2376_v40 = vadd.s32 320, %v2172_v4 }
  0x13   :  { %1858 = vmatprep.subr.msk.mxu0 %vm393_vm5, %v2116_v22  ;;  %1902 = vmatprep.subr.msk.mxu1 %vm425_vm6, %v2116_v22  ;;  %vm376_vm11 = vcmp.eq.s32.totalorder %v2351_v35, %v2199_v14  ;;  %vm408_vm12 = vcmp.eq.s32.totalorder %v2354_v36, %v2199_v14  ;;  %vm391_vm13 = vcmp.eq.s32.totalorder %v2357_v37, %v2199_v14  ;;  %v2393_v41 = vadd.s32 184, %v2172_v4 }
  0x14   :  { %1859 = vmatpush3.msk.msra.mxu0 %vm377_vm7, %v2116_v22  ;;  %1903 = vmatpush3.msk.msra.mxu1 %vm409_vm8, %v2116_v22  ;;  %vm423_vm14 = vcmp.eq.s32.totalorder %v2370_v38, %v2199_v14  ;;  %vm375_vm15 = vcmp.eq.s32.totalorder %v2373_v39, %v2199_v14  ;;  %vm407_vm0 = vcmp.eq.s32.totalorder %v2376_v40, %v2199_v14  ;;  %v2410_v42 = vadd.s32 440, %v2172_v4 }
  0x15   :  { %1860 = vmatprep.subr.msk.mxu0 %vm392_vm9, %v2116_v22  ;;  %1904 = vmatprep.subr.msk.mxu1 %vm424_vm10, %v2116_v22  ;;  %vm390_vm1 = vcmp.eq.s32.totalorder %v2393_v41, %v2199_v14  ;;  %v2423_v43 = vadd.s32 56, %v2172_v4  ;;  %v2426_v44 = vadd.s32 312, %v2172_v4  ;;  %v2429_v45 = vadd.s32 176, %v2172_v4 }
  0x16   :  { %1861 = vmatpush3.msk.msra.mxu0 %vm376_vm11, %v2116_v22  ;;  %1905 = vmatpush3.msk.msra.mxu1 %vm408_vm12, %v2116_v22  ;;  %vm422_vm2 = vcmp.eq.s32.totalorder %v2410_v42, %v2199_v14  ;;  %v2442_v46 = vadd.s32 432, %v2172_v4  ;;  %v2445_v47 = vadd.s32 48, %v2172_v4  ;;  %v2448_v48 = vadd.s32 304, %v2172_v4 }
  0x17   :  { %1862 = vmatprep.subr.msk.mxu0 %vm391_vm13, %v2116_v22  ;;  %1906 = vmatprep.subr.msk.mxu1 %vm423_vm14, %v2116_v22  ;;  %vm374_vm3 = vcmp.eq.s32.totalorder %v2423_v43, %v2199_v14  ;;  %vm406_vm4 = vcmp.eq.s32.totalorder %v2426_v44, %v2199_v14  ;;  %vm389_vm5 = vcmp.eq.s32.totalorder %v2429_v45, %v2199_v14  ;;  %v2465_v49 = vadd.s32 168, %v2172_v4 }
  0x18   :  { %1863 = vmatpush3.msk.msra.mxu0 %vm375_vm15, %v2116_v22  ;;  %1907 = vmatpush3.msk.msra.mxu1 %vm407_vm0, %v2116_v22  ;;  %vm421_vm6 = vcmp.eq.s32.totalorder %v2442_v46, %v2199_v14  ;;  %vm373_vm7 = vcmp.eq.s32.totalorder %v2445_v47, %v2199_v14  ;;  %vm405_vm8 = vcmp.eq.s32.totalorder %v2448_v48, %v2199_v14  ;;  %v2482_v50 = vadd.s32 424, %v2172_v4 }
  0x19   :  { %1864 = vmatprep.subr.msk.mxu0 %vm390_vm1, %v2116_v22  ;;  %1908 = vmatprep.subr.msk.mxu1 %vm422_vm2, %v2116_v22  ;;  %vm388_vm9 = vcmp.eq.s32.totalorder %v2465_v49, %v2199_v14  ;;  %v2495_v51 = vadd.s32 40, %v2172_v4  ;;  %v2498_v52 = vadd.s32 296, %v2172_v4  ;;  %v2501_v53 = vadd.s32 160, %v2172_v4 }
  0x1a   :  { %1865 = vmatpush3.msk.msra.mxu0 %vm374_vm3, %v2116_v22  ;;  %1909 = vmatpush3.msk.msra.mxu1 %vm406_vm4, %v2116_v22  ;;  %vm420_vm10 = vcmp.eq.s32.totalorder %v2482_v50, %v2199_v14  ;;  %v2514_v54 = vadd.s32 416, %v2172_v4  ;;  %v2517_v55 = vadd.s32 32, %v2172_v4  ;;  %v2520_v56 = vadd.s32 288, %v2172_v4 }
  0x1b   :  { %3456 = vst [vmem:[#allocation3_spill] sm:$0xff] %v2495_v51  ;;  %3457 = vst [vmem:[#allocation4_spill] sm:$0xff] %v2498_v52  ;;  %1866 = vmatprep.subr.msk.mxu0 %vm389_vm5, %v2116_v22  ;;  %1910 = vmatprep.subr.msk.mxu1 %vm421_vm6, %v2116_v22  ;;  %vm372_vm11 = vcmp.eq.s32.totalorder %v2495_v51, %v2199_v14  ;;  %vm404_vm12 = vcmp.eq.s32.totalorder %v2498_v52, %v2199_v14  ;;  %v2537_v57 = vadd.s32 152, %v2172_v4 }
  0x1c   :  { %3458 = vst [vmem:[#allocation5_spill] sm:$0xff] %v2501_v53  ;;  %3459 = vst [vmem:[#allocation6_spill] sm:$0xff] %v2514_v54  ;;  %vm387_vm13 = vcmp.eq.s32.totalorder %v2501_v53, %v2199_v14  ;;  %1867 = vmatpush3.msk.msra.mxu0 %vm373_vm7, %v2116_v22  ;;  %1911 = vmatpush3.msk.msra.mxu1 %vm405_vm8, %v2116_v22  ;;  %vm419_vm14 = vcmp.eq.s32.totalorder %v2514_v54, %v2199_v14  ;;  %v2554_v58 = vadd.s32 408, %v2172_v4 }
  0x1d   :  { %3460 = vst [vmem:[#allocation7_spill] sm:$0xff] %v2517_v55  ;;  %3461 = vst [vmem:[#allocation8_spill] sm:$0xff] %v2520_v56  ;;  %vm371_vm15 = vcmp.eq.s32.totalorder %v2517_v55, %v2199_v14  ;;  %vm403_vm0 = vcmp.eq.s32.totalorder %v2520_v56, %v2199_v14  ;;  %1868 = vmatprep.subr.msk.mxu0 %vm388_vm9, %v2116_v22  ;;  %1912 = vmatprep.subr.msk.mxu1 %vm420_vm10, %v2116_v22  ;;  %v2567_v59 = vadd.s32 24, %v2172_v4 }
  0x1e   :  { %3462 = vst [vmem:[#allocation9_spill] sm:$0xff] %v2537_v57  ;;  %3463 = vst [vmem:[#allocation10_spill] sm:$0xff] %v2554_v58  ;;  %vm386_vm1 = vcmp.eq.s32.totalorder %v2537_v57, %v2199_v14  ;;  %v2570_v60 = vadd.s32 280, %v2172_v4  ;;  %v2573_v61 = vadd.s32 144, %v2172_v4  ;;  %1869 = vmatpush3.msk.msra.mxu0 %vm372_vm11, %v2116_v22  ;;  %1913 = vmatpush3.msk.msra.mxu1 %vm404_vm12, %v2116_v22  ;;  %v2586_v62 = vadd.s32 400, %v2172_v4 }
  0x1f   :  { %3464 = vst [vmem:[#allocation11_spill] sm:$0xff] %v2567_v59  ;;  %vm418_vm2 = vcmp.eq.s32.totalorder %v2554_v58, %v2199_v14  ;;  %v2589_v63 = vadd.s32 16, %v2172_v4  ;;  %v2592_v0 = vadd.s32 272, %v2172_v4  ;;  %1870 = vmatprep.subr.msk.mxu0 %vm387_vm13, %v2116_v22  ;;  %1914 = vmatprep.subr.msk.mxu1 %vm419_vm14, %v2116_v22  ;;  %vm370_vm3 = vcmp.eq.s32.totalorder %v2567_v59, %v2199_v14 }
  0x20   :  { %3465 = vst [vmem:[#allocation12_spill] sm:$0xff] %v2570_v60  ;;  %3466 = vst [vmem:[#allocation13_spill] sm:$0xff] %v2573_v61  ;;  %vm402_vm4 = vcmp.eq.s32.totalorder %v2570_v60, %v2199_v14  ;;  %v2607_v1 = vadd.s32 136, %v2172_v4  ;;  %1871 = vmatpush3.msk.msra.mxu0 %vm371_vm15, %v2116_v22  ;;  %1915 = vmatpush3.msk.msra.mxu1 %vm403_vm0, %v2116_v22  ;;  %vm385_vm5 = vcmp.eq.s32.totalorder %v2573_v61, %v2199_v14 }
  0x21   :  { %3467 = vst [vmem:[#allocation14_spill] sm:$0xff] %v2586_v62  ;;  %3468 = vst [vmem:[#allocation15_spill] sm:$0xff] %v2589_v63  ;;  %vm417_vm6 = vcmp.eq.s32.totalorder %v2586_v62, %v2199_v14  ;;  %vm369_vm7 = vcmp.eq.s32.totalorder %v2589_v63, %v2199_v14  ;;  %v2624_v2 = vadd.s32 392, %v2172_v4  ;;  %1872 = vmatprep.subr.msk.mxu0 %vm386_vm1, %v2116_v22  ;;  %1916 = vmatprep.subr.msk.mxu1 %vm418_vm2, %v2116_v22 }
  0x22   :  { %3469 = vst [vmem:[#allocation16_spill] sm:$0xff] %v2592_v0  ;;  %3470 = vst [vmem:[#allocation17_spill] sm:$0xff] %v2607_v1  ;;  %vm401_vm8 = vcmp.eq.s32.totalorder %v2592_v0, %v2199_v14  ;;  %v2637_v3 = vadd.s32 8, %v2172_v4  ;;  %v2640_v5 = vadd.s32 264, %v2172_v4  ;;  %v2643_v60 = vadd.s32 128, %v2172_v4  ;;  %1873 = vmatpush3.msk.msra.mxu0 %vm370_vm3, %v2116_v22  ;;  %1917 = vmatpush3.msk.msra.mxu1 %vm402_vm4, %v2116_v22 }
  0x23   :  { %3471 = vst [vmem:[#allocation18_spill] sm:$0xff] %v2624_v2  ;;  %vm384_vm9 = vcmp.eq.s32.totalorder %v2607_v1, %v2199_v14  ;;  %vm416_vm10 = vcmp.eq.s32.totalorder %v2624_v2, %v2199_v14  ;;  %v2652_v59 = vadd.s32 384, %v2172_v4  ;;  %v2655_v58 = vadd.s32 256, %v2172_v4  ;;  %1874 = vmatprep.subr.msk.mxu0 %vm385_vm5, %v2116_v22  ;;  %1918 = vmatprep.subr.msk.mxu1 %vm417_vm6, %v2116_v22  ;;  %v767_v2 = vld [vmem:[%s3427_s2] sm:$0xff]  ;;  %v769_v1 = vld [vmem:[%s3427_s2 + $0x10] sm:$0xff] }
  0x24   :  { %3472 = vst [vmem:[#allocation19_spill] sm:$0xff] %v2637_v3  ;;  %3473 = vst [vmem:[#allocation20_spill] sm:$0xff] %v2640_v5  ;;  %vm368_vm11 = vcmp.eq.s32.totalorder %v2637_v3, %v2199_v14  ;;  %vm400_vm12 = vcmp.eq.s32.totalorder %v2640_v5, %v2199_v14  ;;  %vm367_vm13 = vcmp.eq.s32.totalorder %v2172_v4, %v2199_v14  ;;  %v330_v57 = vadd.s32 760, %v2172_v4 }
  0x25   :  { %3474 = vst [vmem:[#allocation21_spill] sm:$0xff] %v2643_v60  ;;  %3475 = vst [vmem:[#allocation22_spill] sm:$0xff] %v2652_v59  ;;  %1875 = vmatpush3.msk.msra.mxu0 %vm369_vm7, %v2116_v22  ;;  %1919 = vmatpush3.msk.msra.mxu1 %vm401_vm8, %v2116_v22  ;;  %vm383_vm14 = vcmp.eq.s32.totalorder %v2643_v60, %v2199_v14  ;;  %vm415_vm15 = vcmp.eq.s32.totalorder %v2652_v59, %v2199_v14  ;;  %v362_v62 = vadd.s32 1016, %v2172_v4 }
  0x26   :  { %3476 = vst [vmem:[#allocation23_spill] sm:$0xff] %v2655_v58  ;;  %v314_v61 = vadd.s32 632, %v2172_v4  ;;  %1876 = vmatprep.subr.msk.mxu0 %vm384_vm9, %v2116_v22  ;;  %1920 = vmatprep.subr.msk.mxu1 %vm416_vm10, %v2116_v22  ;;  %vm399_vm0 = vcmp.eq.s32.totalorder %v2655_v58, %v2199_v14  ;;  %v346_v0 = vadd.s32 888, %v2172_v4  ;;  %v329_v63 = vadd.s32 752, %v2172_v4 }
  0x27   :  { %v361_v56 = vadd.s32 1008, %v2172_v4  ;;  %1877 = vmatpush3.msk.msra.mxu0 %vm368_vm11, %v2116_v22  ;;  %1921 = vmatpush3.msk.msra.mxu1 %vm400_vm12, %v2116_v22  ;;  %v313_v55 = vadd.s32 624, %v2172_v4  ;;  %v345_v54 = vadd.s32 880, %v2172_v4  ;;  %vm462_vm1 = vcmp.eq.s32.totalorder %v330_v57, %v2199_v14 }
  0x28   :  { %1878 = vmatprep.subr.msk.mxu0 %vm383_vm14, %v2116_v22  ;;  %1922 = vmatprep.subr.msk.mxu1 %vm415_vm15, %v2116_v22  ;;  %vm494_vm2 = vcmp.eq.s32.totalorder %v362_v62, %v2199_v14  ;;  %vm446_vm3 = vcmp.eq.s32.totalorder %v314_v61, %v2199_v14  ;;  %v328_v5 = vadd.s32 744, %v2172_v4  ;;  %vm478_vm4 = vcmp.eq.s32.totalorder %v346_v0, %v2199_v14 }
  0x29   :  { %1879 = vmatpush3.msk.msra.mxu0 %vm367_vm13, %v2116_v22  ;;  %1923 = vmatpush3.msk.msra.mxu1 %vm399_vm0, %v2116_v22  ;;  %vm461_vm5 = vcmp.eq.s32.totalorder %v329_v63, %v2199_v14  ;;  %v360_v59 = vadd.s32 1000, %v2172_v4  ;;  %v312_v60 = vadd.s32 616, %v2172_v4  ;;  %vm493_vm6 = vcmp.eq.s32.totalorder %v361_v56, %v2199_v14 }
  0x2a   :  { %864 = vmatmul.mubr.f32.vlgmr.msra.gmra.mxu0 %v767_v2  ;;  %949 = vmatmul.mubr.f32.vlgmr.msra.gmra.mxu1 %v769_v1  ;;  %v344_v3 = vadd.s32 872, %v2172_v4  ;;  %v327_v53 = vadd.s32 736, %v2172_v4  ;;  %v359_v52 = vadd.s32 992, %v2172_v4  ;;  %vm445_vm7 = vcmp.eq.s32.totalorder %v313_v55, %v2199_v14 }
  0x2b   :  { %1936 = vmatprep.subr.msk.mxu0 %vm462_vm1, %v2116_v22  ;;  %1980 = vmatprep.subr.msk.mxu1 %vm494_vm2, %v2116_v22  ;;  %vm477_vm8 = vcmp.eq.s32.totalorder %v345_v54, %v2199_v14  ;;  %v311_v1 = vadd.s32 608, %v2172_v4  ;;  %v343_v2 = vadd.s32 864, %v2172_v4  ;;  %vm460_vm9 = vcmp.eq.s32.totalorder %v328_v5, %v2199_v14 }
  0x2c   :  { %1937 = vmatpush3.msk.msra.mxu0 %vm446_vm3, %v2116_v22  ;;  %1981 = vmatpush3.msk.msra.mxu1 %vm478_vm4, %v2116_v22  ;;  %vm492_vm10 = vcmp.eq.s32.totalorder %v360_v59, %v2199_v14  ;;  %vm444_vm11 = vcmp.eq.s32.totalorder %v312_v60, %v2199_v14  ;;  %v326_v57 = vadd.s32 728, %v2172_v4  ;;  %vm476_vm12 = vcmp.eq.s32.totalorder %v344_v3, %v2199_v14 }
  0x2d   :  { %1938 = vmatprep.subr.msk.mxu0 %vm461_vm5, %v2116_v22  ;;  %1982 = vmatprep.subr.msk.mxu1 %vm493_vm6, %v2116_v22  ;;  %vm459_vm13 = vcmp.eq.s32.totalorder %v327_v53, %v2199_v14  ;;  %v358_v61 = vadd.s32 984, %v2172_v4  ;;  %v310_v62 = vadd.s32 600, %v2172_v4  ;;  %vm491_vm14 = vcmp.eq.s32.totalorder %v359_v52, %v2199_v14 }
  0x2e   :  { %1939 = vmatpush3.msk.msra.mxu0 %vm445_vm7, %v2116_v22  ;;  %1983 = vmatpush3.msk.msra.mxu1 %vm477_vm8, %v2116_v22  ;;  %v342_v56 = vadd.s32 856, %v2172_v4  ;;  %v325_v63 = vadd.s32 720, %v2172_v4  ;;  %v357_v0 = vadd.s32 976, %v2172_v4  ;;  %vm443_vm15 = vcmp.eq.s32.totalorder %v311_v1, %v2199_v14 }
  0x2f   :  { %1940 = vmatprep.subr.msk.mxu0 %vm460_vm9, %v2116_v22  ;;  %1984 = vmatprep.subr.msk.mxu1 %vm492_vm10, %v2116_v22  ;;  %vm475_vm0 = vcmp.eq.s32.totalorder %v343_v2, %v2199_v14  ;;  %v309_v54 = vadd.s32 592, %v2172_v4  ;;  %v341_v55 = vadd.s32 848, %v2172_v4  ;;  %vm458_vm1 = vcmp.eq.s32.totalorder %v326_v57, %v2199_v14 }
  0x30   :  { %1941 = vmatpush3.msk.msra.mxu0 %vm444_vm11, %v2116_v22  ;;  %1985 = vmatpush3.msk.msra.mxu1 %vm476_vm12, %v2116_v22  ;;  %vm490_vm2 = vcmp.eq.s32.totalorder %v358_v61, %v2199_v14  ;;  %vm442_vm3 = vcmp.eq.s32.totalorder %v310_v62, %v2199_v14  ;;  %v324_v59 = vadd.s32 712, %v2172_v4  ;;  %vm474_vm4 = vcmp.eq.s32.totalorder %v342_v56, %v2199_v14 }
  0x31   :  { %1942 = vmatprep.subr.msk.mxu0 %vm459_vm13, %v2116_v22  ;;  %1986 = vmatprep.subr.msk.mxu1 %vm491_vm14, %v2116_v22  ;;  %vm457_vm5 = vcmp.eq.s32.totalorder %v325_v63, %v2199_v14  ;;  %v356_v60 = vadd.s32 968, %v2172_v4  ;;  %v308_v3 = vadd.s32 584, %v2172_v4  ;;  %vm489_vm6 = vcmp.eq.s32.totalorder %v357_v0, %v2199_v14 }
  0x32   :  { %1943 = vmatpush3.msk.msra.mxu0 %vm443_vm15, %v2116_v22  ;;  %1987 = vmatpush3.msk.msra.mxu1 %vm475_vm0, %v2116_v22  ;;  %v340_v52 = vadd.s32 840, %v2172_v4  ;;  %v323_v53 = vadd.s32 704, %v2172_v4  ;;  %v355_v5 = vadd.s32 960, %v2172_v4  ;;  %vm441_vm7 = vcmp.eq.s32.totalorder %v309_v54, %v2199_v14 }
  0x33   :  { %1944 = vmatprep.subr.msk.mxu0 %vm458_vm1, %v2116_v22  ;;  %1988 = vmatprep.subr.msk.mxu1 %vm490_vm2, %v2116_v22  ;;  %vm473_vm8 = vcmp.eq.s32.totalorder %v341_v55, %v2199_v14  ;;  %v307_v1 = vadd.s32 576, %v2172_v4  ;;  %v339_v2 = vadd.s32 832, %v2172_v4  ;;  %vm456_vm9 = vcmp.eq.s32.totalorder %v324_v59, %v2199_v14  ;;  %v776_v59 = vld [vmem:[%s3427_s2 + $0x48] sm:$0xff] }
  0x34   :  { %1945 = vmatpush3.msk.msra.mxu0 %vm442_vm3, %v2116_v22  ;;  %1989 = vmatpush3.msk.msra.mxu1 %vm474_vm4, %v2116_v22  ;;  %vm488_vm10 = vcmp.eq.s32.totalorder %v356_v60, %v2199_v14  ;;  %v322_v57 = vadd.s32 696, %v2172_v4  ;;  %vm440_vm11 = vcmp.eq.s32.totalorder %v308_v3, %v2199_v14  ;;  %vm472_vm12 = vcmp.eq.s32.totalorder %v340_v52, %v2199_v14  ;;  %v778_v60 = vld [vmem:[%s3427_s2 + $0x58] sm:$0xff] }
  0x35   :  { %1946 = vmatprep.subr.msk.mxu0 %vm457_vm5, %v2116_v22  ;;  %1990 = vmatprep.subr.msk.mxu1 %vm489_vm6, %v2116_v22  ;;  %v354_v61 = vadd.s32 952, %v2172_v4  ;;  %v306_v62 = vadd.s32 568, %v2172_v4  ;;  %vm455_vm13 = vcmp.eq.s32.totalorder %v323_v53, %v2199_v14  ;;  %vm487_vm14 = vcmp.eq.s32.totalorder %v355_v5, %v2199_v14 }
  0x36   :  { %1947 = vmatpush3.msk.msra.mxu0 %vm441_vm7, %v2116_v22  ;;  %1991 = vmatpush3.msk.msra.mxu1 %vm473_vm8, %v2116_v22  ;;  %v338_v56 = vadd.s32 824, %v2172_v4  ;;  %vm439_vm15 = vcmp.eq.s32.totalorder %v307_v1, %v2199_v14  ;;  %vm471_vm0 = vcmp.eq.s32.totalorder %v339_v2, %v2199_v14  ;;  %v321_v63 = vadd.s32 688, %v2172_v4  ;;  %v775_v1 = vld [vmem:[%s3427_s2 + $0x40] sm:$0xff]  ;;  %v777_v2 = vld [vmem:[%s3427_s2 + $0x50] sm:$0xff] }
  0x37   :  { %1948 = vmatprep.subr.msk.mxu0 %vm456_vm9, %v2116_v22  ;;  %1992 = vmatprep.subr.msk.mxu1 %vm488_vm10, %v2116_v22  ;;  %v353_v0 = vadd.s32 944, %v2172_v4  ;;  %vm454_vm1 = vcmp.eq.s32.totalorder %v322_v57, %v2199_v14  ;;  %vm486_vm2 = vcmp.eq.s32.totalorder %v354_v61, %v2199_v14  ;;  %vm438_vm3 = vcmp.eq.s32.totalorder %v306_v62, %v2199_v14 }
  0x38   :  { %1949 = vmatpush3.msk.msra.mxu0 %vm440_vm11, %v2116_v22  ;;  %1993 = vmatpush3.msk.msra.mxu1 %vm472_vm12, %v2116_v22  ;;  %vm470_vm4 = vcmp.eq.s32.totalorder %v338_v56, %v2199_v14  ;;  %v305_v54 = vadd.s32 560, %v2172_v4  ;;  %v337_v55 = vadd.s32 816, %v2172_v4  ;;  %v320_v3 = vadd.s32 680, %v2172_v4 }
  0x39   :  { %1950 = vmatprep.subr.msk.mxu0 %vm455_vm13, %v2116_v22  ;;  %1994 = vmatprep.subr.msk.mxu1 %vm487_vm14, %v2116_v22  ;;  %v352_v52 = vadd.s32 936, %v2172_v4  ;;  %vm453_vm5 = vcmp.eq.s32.totalorder %v321_v63, %v2199_v14  ;;  %vm485_vm6 = vcmp.eq.s32.totalorder %v353_v0, %v2199_v14  ;;  %v304_v53 = vadd.s32 552, %v2172_v4  ;;  %v784_v63 = vld [vmem:[%s3427_s2 + $0x88] sm:$0xff]  ;;  %v786_v0 = vld [vmem:[%s3427_s2 + $0x98] sm:$0xff] }
  0x3a   :  { %1951 = vmatpush3.msk.msra.mxu0 %vm439_vm15, %v2116_v22  ;;  %1995 = vmatpush3.msk.msra.mxu1 %vm471_vm0, %v2116_v22  ;;  %v336_v5 = vadd.s32 808, %v2172_v4  ;;  %vm437_vm7 = vcmp.eq.s32.totalorder %v305_v54, %v2199_v14  ;;  %vm469_vm8 = vcmp.eq.s32.totalorder %v337_v55, %v2199_v14  ;;  %v319_v57 = vadd.s32 672, %v2172_v4 }
  0x3b   :  { %1952 = vmatprep.subr.msk.mxu0 %vm454_vm1, %v2116_v22  ;;  %1996 = vmatprep.subr.msk.mxu1 %vm486_vm2, %v2116_v22  ;;  %v351_v61 = vadd.s32 928, %v2172_v4  ;;  %vm452_vm9 = vcmp.eq.s32.totalorder %v320_v3, %v2199_v14  ;;  %vm484_vm10 = vcmp.eq.s32.totalorder %v352_v52, %v2199_v14  ;;  %vm436_vm11 = vcmp.eq.s32.totalorder %v304_v53, %v2199_v14  ;;  %v783_v3 = vld [vmem:[%s3427_s2 + $0x80] sm:$0xff]  ;;  %v785_v52 = vld [vmem:[%s3427_s2 + $0x90] sm:$0xff] }
  0x3c   :  { %1953 = vmatpush3.msk.msra.mxu0 %vm438_vm3, %v2116_v22  ;;  %1997 = vmatpush3.msk.msra.mxu1 %vm470_vm4, %v2116_v22  ;;  %vm468_vm12 = vcmp.eq.s32.totalorder %v336_v5, %v2199_v14  ;;  %v303_v62 = vadd.s32 544, %v2172_v4  ;;  %v335_v56 = vadd.s32 800, %v2172_v4  ;;  %v318_v54 = vadd.s32 664, %v2172_v4 }
  0x3d   :  { %868 = vmatprep.mubr.f32.mxu0 %v776_v59  ;;  %953 = vmatprep.mubr.f32.mxu1 %v778_v60  ;;  %v350_v55 = vadd.s32 920, %v2172_v4  ;;  %v302_v59 = vadd.s32 536, %v2172_v4  ;;  %vm451_vm13 = vcmp.eq.s32.totalorder %v319_v57, %v2199_v14  ;;  %vm483_vm14 = vcmp.eq.s32.totalorder %v351_v61, %v2199_v14  ;;  %v792_v61 = vld [vmem:[%s3427_s2 + $0xc8] sm:$0xff] }
  0x3e   :  { %1954 = vmatprep.subr.msk.mxu0 %vm453_vm5, %v2116_v22  ;;  %1998 = vmatprep.subr.msk.mxu1 %vm485_vm6, %v2116_v22  ;;  %v334_v60 = vadd.s32 792, %v2172_v4  ;;  %vm435_vm15 = vcmp.eq.s32.totalorder %v303_v62, %v2199_v14  ;;  %vm467_vm0 = vcmp.eq.s32.totalorder %v335_v56, %v2199_v14  ;;  %v317_v53 = vadd.s32 656, %v2172_v4 }
  0x3f   :  { %869 = vmatmul.mubr.f32.gmra.mxu0 %v775_v1  ;;  %954 = vmatmul.mubr.f32.gmra.mxu1 %v777_v2  ;;  %v31_v1 = vld [vmem:[%s3426_s0] sm:$0x1]  ;;  %v349_v5 = vadd.s32 912, %v2172_v4  ;;  %vm450_vm1 = vcmp.eq.s32.totalorder %v318_v54, %v2199_v14  ;;  %vm482_vm2 = vcmp.eq.s32.totalorder %v350_v55, %v2199_v14  ;;  %vm434_vm3 = vcmp.eq.s32.totalorder %v302_v59, %v2199_v14  ;;  %v793_v55 = vld [vmem:[%s3427_s2 + $0xd0] sm:$0xff] }
  0x40   :  { %1955 = vmatpush3.msk.msra.mxu0 %vm437_vm7, %v2116_v22  ;;  %1999 = vmatpush3.msk.msra.mxu1 %vm469_vm8, %v2116_v22  ;;  %vm466_vm4 = vcmp.eq.s32.totalorder %v334_v60, %v2199_v14  ;;  %v301_v2 = vadd.s32 528, %v2172_v4  ;;  %v333_v57 = vadd.s32 784, %v2172_v4  ;;  %vm32_vm5 = vcmp.lt.s32.totalorder %v31_v1, 511  ;;  %v791_v54 = vld [vmem:[%s3427_s2 + $0xc0] sm:$0xff] }
  0x41   :  { %1956 = vmatprep.subr.msk.mxu0 %vm452_vm9, %v2116_v22  ;;  %2000 = vmatprep.subr.msk.mxu1 %vm484_vm10, %v2116_v22  ;;  %v13_v62 = vstv %s3428_s7  ;;  %vm449_vm6 = vcmp.eq.s32.totalorder %v317_v53, %v2199_v14  ;;  %vm481_vm7 = vcmp.eq.s32.totalorder %v349_v5, %v2199_v14  ;;  %v300_v56 = vadd.s32 520, %v2172_v4  ;;  %v772_v53 = vld [vmem:[%s3427_s2 + $0x28] sm:$0xff]  ;;  %v762_v5 = vld [vmem:[%s3429_s1 + $0x58] sm:$0xff] }
  0x42   :  { %1957 = vmatpush3.msk.msra.mxu0 %vm436_vm11, %v2116_v22  ;;  %2001 = vmatpush3.msk.msra.mxu1 %vm468_vm12, %v2116_v22  ;;  %14 = vst [vmem:[#allocation2] sm:$0x1] %v13_v62  ;;  %v315_v58 = vadd.s32 640, %v2172_v4  ;;  %v347_v62 = vadd.s32 896, %v2172_v4  ;;  %v33_v51 = vsel %vm32_vm5, %v31_v1, 511  ;;  %vm433_vm8 = vcmp.eq.s32.totalorder %v301_v2, %v2199_v14 }
  0x43   :  { %873 = vmatprep.mubr.f32.mxu0 %v784_v63  ;;  %958 = vmatprep.mubr.f32.mxu1 %v786_v0  ;;  %v794_v63 = vld [vmem:[%s3427_s2 + $0xd8] sm:$0xff]  ;;  %v316_v0 = vadd.s32 648, %v2172_v4  ;;  %vm465_vm9 = vcmp.eq.s32.totalorder %v333_v57, %v2199_v14  ;;  %v299_v59 = vadd.s32 512, %v2172_v4  ;;  %v331_v60 = vadd.s32 768, %v2172_v4  ;;  %v1316_v57 = vld [vmem:[%s3430_s4 + $0x8] sm:$0xff] }
  0x44   :  { %1958 = vmatprep.subr.msk.mxu0 %vm451_vm13, %v2116_v22  ;;  %2002 = vmatprep.subr.msk.mxu1 %vm483_vm14, %v2116_v22  ;;  %vm432_vm12 = vcmp.eq.s32.totalorder %v300_v56, %v2199_v14  ;;  %v3013_v1 = vrot.slane %v33_v51, %v2178_v7  ;;  %vm447_vm14 = vcmp.eq.s32.totalorder %v315_v58, %v2199_v14  ;;  %v771_v51 = vld [vmem:[%s3427_s2 + $0x20] sm:$0xff]  ;;  %v774_v58 = vld [vmem:[%s3427_s2 + $0x38] sm:$0xff]  ;;  %v2117_v2 = vmov 0  }
  0x45   :  { %874 = vmatmul.mubr.f32.gmra.mxu0 %v783_v3  ;;  %959 = vmatmul.mubr.f32.gmra.mxu1 %v785_v52  ;;  %v348_v3 = vadd.s32 904, %v2172_v4  ;;  %v332_v52 = vadd.s32 776, %v2172_v4  ;;  %vm448_vm10 = vcmp.eq.s32.totalorder %v316_v0, %v2199_v14  ;;  %v761_v0 = vld [vmem:[%s3429_s1 + $0x50] sm:$0xff]  ;;  %v766_v56 = vld [vmem:[%s3429_s1 + $0x78] sm:$0xff] }
  0x46   :  { %1959 = vmatpush3.msk.msra.mxu0 %vm435_vm15, %v2116_v22  ;;  %2003 = vmatpush3.msk.msra.mxu1 %vm467_vm0, %v2116_v22  ;;  %vm479_vm15 = vcmp.eq.s32.totalorder %v347_v62, %v2199_v14  ;;  %vm431_vm0 = vcmp.eq.s32.totalorder %v299_v59, %v2199_v14  ;;  %vm154_vm5 = vcmp.eq.s32.totalorder %v2187_v10, %v3013_v1  ;;  %v781_v10 = vld [vmem:[%s3427_s2 + $0x70] sm:$0xff] }
  0x47   :  { %1960 = vmatprep.subr.msk.mxu0 %vm450_vm1, %v2116_v22  ;;  %2004 = vmatprep.subr.msk.mxu1 %vm482_vm2, %v2116_v22  ;;  %vm480_vm11 = vcmp.eq.s32.totalorder %v348_v3, %v2199_v14  ;;  %vm464_vm13 = vcmp.eq.s32.totalorder %v332_v52, %v2199_v14  ;;  %vm463_vm1 = vcmp.eq.s32.totalorder %v331_v60, %v2199_v14  ;;  %v773_v14 = vld [vmem:[%s3427_s2 + $0x30] sm:$0xff]  ;;  %v764_v3 = vld [vmem:[%s3429_s1 + $0x68] sm:$0xff]  ;;  %v1310_v52 = vld [vmem:[%s3432_s3] sm:$0xff] }
  0x48   :  { %1961 = vmatpush3.msk.msra.mxu0 %vm434_vm3, %v2116_v22  ;;  %2005 = vmatpush3.msk.msra.mxu1 %vm466_vm4, %v2116_v22  ;;  %vm138_vm2 = vcmp.eq.s32.totalorder %v2175_v6, %v3013_v1  ;;  %vm170_vm3 = vcmp.eq.s32.totalorder %v2181_v8, %v3013_v1  ;;  %vm122_vm4 = vcmp.eq.s32.totalorder %v2184_v9, %v3013_v1  ;;  %v780_v6 = vld [vmem:[%s3427_s2 + $0x68] sm:$0xff]  ;;  %v779_v8 = vld [vmem:[%s3427_s2 + $0x60] sm:$0xff]  ;;  %v782_v9 = vld [vmem:[%s3427_s2 + $0x78] sm:$0xff] }
  0x49   :  { %878 = vmatprep.mubr.f32.mxu0 %v792_v61  ;;  %963 = vmatprep.mubr.f32.mxu1 %v794_v63  ;;  %v1320_v61 = vld [vmem:[%s3431_s5 + $0x8] sm:$0xff]  ;;  %v759_v63 = vld [vmem:[%s3429_s1 + $0x40] sm:$0xff]  ;;  %v765_v62 = vld [vmem:[%s3429_s1 + $0x70] sm:$0xff] }
  0x4a   :  { %1962 = vmatprep.subr.msk.mxu0 %vm449_vm6, %v2116_v22  ;;  %2006 = vmatprep.subr.msk.mxu1 %vm481_vm7, %v2116_v22  ;;  %vm137_vm6 = vcmp.eq.s32.totalorder %v2190_v11, %v3013_v1  ;;  %vm169_vm7 = vcmp.eq.s32.totalorder %v2193_v12, %v3013_v1  ;;  %v788_v11 = vld [vmem:[%s3427_s2 + $0xa8] sm:$0xff]  ;;  %v787_v12 = vld [vmem:[%s3427_s2 + $0xa0] sm:$0xff]  ;;  %v1317_v59 = vld [vmem:[%s3430_s4 + $0x10] sm:$0xff] }
  0x4b   :  { %879 = vmatmul.mubr.f32.gmra.mxu0 %v791_v54  ;;  %964 = vmatmul.mubr.f32.gmra.mxu1 %v793_v55  ;;  %v1311_v54 = vld [vmem:[%s3432_s3 + $0x8] sm:$0xff]  ;;  %v763_v55 = vld [vmem:[%s3429_s1 + $0x60] sm:$0xff]  ;;  %v1321_v60 = vld [vmem:[%s3431_s5 + $0x10] sm:$0xff] }
  0x4c   :  { %1963 = vmatpush3.msk.msra.mxu0 %vm433_vm8, %v2116_v22  ;;  %2007 = vmatpush3.msk.msra.mxu1 %vm465_vm9, %v2116_v22  ;;  %vm121_vm8 = vcmp.eq.s32.totalorder %v2196_v13, %v3013_v1  ;;  %vm153_vm9 = vcmp.eq.s32.totalorder %v2202_v15, %v3013_v1  ;;  %v790_v13 = vld [vmem:[%s3427_s2 + $0xb8] sm:$0xff]  ;;  %v789_v15 = vld [vmem:[%s3427_s2 + $0xb0] sm:$0xff] }
  0x4d   :  { %1964 = vmatprep.subr.msk.mxu0 %vm448_vm10, %v2116_v22  ;;  %2008 = vmatprep.subr.msk.mxu1 %vm480_vm11, %v2116_v22  ;;  %vm136_vm10 = vcmp.eq.s32.totalorder %v2205_v16, %v3013_v1  ;;  %vm168_vm11 = vcmp.eq.s32.totalorder %v2208_v17, %v3013_v1  ;;  %v796_v16 = vld [vmem:[%s3427_s2 + $0xe8] sm:$0xff]  ;;  %v795_v17 = vld [vmem:[%s3427_s2 + $0xe0] sm:$0xff] }
  0x4e   :  { %1965 = vmatpush3.msk.msra.mxu0 %vm432_vm12, %v2116_v22  ;;  %2009 = vmatpush3.msk.msra.mxu1 %vm464_vm13, %v2116_v22  ;;  %vm120_vm12 = vcmp.eq.s32.totalorder %v2211_v18, %v3013_v1  ;;  %vm152_vm13 = vcmp.eq.s32.totalorder %v2214_v19, %v3013_v1  ;;  %v798_v18 = vld [vmem:[%s3427_s2 + $0xf8] sm:$0xff]  ;;  %v797_v19 = vld [vmem:[%s3427_s2 + $0xf0] sm:$0xff] }
  0x4f   :  { %1966 = vmatprep.subr.msk.mxu0 %vm447_vm14, %v2116_v22  ;;  %2010 = vmatprep.subr.msk.mxu1 %vm479_vm15, %v2116_v22  ;;  %vm135_vm14 = vcmp.eq.s32.totalorder %v2217_v20, %v3013_v1  ;;  %vm167_vm15 = vcmp.eq.s32.totalorder %v2220_v21, %v3013_v1  ;;  %v3477_v20 = vld [vmem:[#allocation3_spill] sm:$0xff]  ;;  %v3478_v21 = vld [vmem:[#allocation4_spill] sm:$0xff] }
  0x50   :  { %1967 = vmatpush3.msk.msra.mxu0 %vm431_vm0, %v2116_v22  ;;  %1033 = vmatprep.mubr.f32.mxu0 %v772_v53  ;;  %vm119_vm0 = vcmp.eq.s32.totalorder %v2239_v23, %v3013_v1  ;;  %v3479_v23 = vld [vmem:[#allocation5_spill] sm:$0xff] }
  0x51   :  { %2011 = vmatpush3.msk.msra.mxu1 %vm463_vm1, %v2116_v22  ;;  %1034 = vmatmul.mubr.f32.vlgmr.msra.gmra.mxu0 %v771_v51  ;;  %vm151_vm1 = vcmp.eq.s32.totalorder %v2250_v24, %v3013_v1  ;;  %v3480_v24 = vld [vmem:[#allocation6_spill] sm:$0xff] }
  0x52   :  { %1118 = vmatprep.mubr.f32.mxu1 %v774_v58  ;;  %2024 = vmatprep.subr.msk.mxu0 %vm138_vm2, %v2116_v22  ;;  %vm134_vm2 = vcmp.eq.s32.totalorder %v2261_v25, %v3013_v1  ;;  %v3481_v25 = vld [vmem:[#allocation7_spill] sm:$0xff]  ;;  %v1318_v53 = vld [vmem:[%s3430_s4 + $0x18] sm:$0xff] }
  0x53   :  { %2068 = vmatprep.subr.msk.mxu1 %vm170_vm3, %v2116_v22  ;;  %1119 = vmatmul.mubr.f32.vlgmr.msra.gmra.mxu1 %v773_v14  ;;  %vm166_vm3 = vcmp.eq.s32.totalorder %v2272_v26, %v3013_v1  ;;  %v3482_v26 = vld [vmem:[#allocation8_spill] sm:$0xff]  ;;  %v1322_v51 = vld [vmem:[%s3431_s5 + $0x18] sm:$0xff]  ;;  %v1411_v14 = vld [vmem:[%s3433_s6] sm:$0xff] }
  0x54   :  { %2025 = vmatpush3.msk.msra.mxu0 %vm122_vm4, %v2116_v22  ;;  %2069 = vmatpush3.msk.msra.mxu1 %vm154_vm5, %v2116_v22  ;;  %vm118_vm4 = vcmp.eq.s32.totalorder %v2279_v27, %v3013_v1  ;;  %vm150_vm5 = vcmp.eq.s32.totalorder %v2282_v28, %v3013_v1  ;;  %v3483_v27 = vld [vmem:[#allocation9_spill] sm:$0xff]  ;;  %v3484_v28 = vld [vmem:[#allocation10_spill] sm:$0xff] }
  0x55   :  { %2026 = vmatprep.subr.msk.mxu0 %vm137_vm6, %v2116_v22  ;;  %2070 = vmatprep.subr.msk.mxu1 %vm169_vm7, %v2116_v22  ;;  %vm133_vm6 = vcmp.eq.s32.totalorder %v2285_v29, %v3013_v1  ;;  %vm165_vm7 = vcmp.eq.s32.totalorder %v2298_v30, %v3013_v1  ;;  %v3485_v29 = vld [vmem:[#allocation11_spill] sm:$0xff]  ;;  %v3486_v30 = vld [vmem:[#allocation12_spill] sm:$0xff]  ;;  %v1313_v58 = vld [vmem:[%s3432_s3 + $0x18] sm:$0xff] }
  0x56   :  { %1038 = vmatprep.mubr.f32.mxu0 %v780_v6  ;;  %2027 = vmatpush3.msk.msra.mxu0 %vm121_vm8, %v2116_v22  ;;  %vm117_vm8 = vcmp.eq.s32.totalorder %v2301_v31, %v3013_v1  ;;  %v3487_v31 = vld [vmem:[#allocation13_spill] sm:$0xff]  ;;  %v1412_v6 = vld [vmem:[%s3433_s6 + $0x8] sm:$0xff] }
  0x57   :  { %2071 = vmatpush3.msk.msra.mxu1 %vm153_vm9, %v2116_v22  ;;  %1039 = vmatmul.mubr.f32.gmra.mxu0 %v779_v8  ;;  %vm149_vm9 = vcmp.eq.s32.totalorder %v2304_v32, %v3013_v1  ;;  %v3488_v32 = vld [vmem:[#allocation14_spill] sm:$0xff]  ;;  %v1413_v8 = vld [vmem:[%s3433_s6 + $0x10] sm:$0xff] }
  0x58   :  { %2028 = vmatprep.subr.msk.mxu0 %vm136_vm10, %v2116_v22  ;;  %2072 = vmatprep.subr.msk.mxu1 %vm168_vm11, %v2116_v22  ;;  %vm132_vm10 = vcmp.eq.s32.totalorder %v2321_v33, %v3013_v1  ;;  %vm164_vm11 = vcmp.eq.s32.totalorder %v2338_v34, %v3013_v1  ;;  %v3489_v33 = vld [vmem:[#allocation15_spill] sm:$0xff]  ;;  %v3490_v34 = vld [vmem:[#allocation16_spill] sm:$0xff] }
  0x59   :  { %1123 = vmatprep.mubr.f32.mxu1 %v782_v9  ;;  %2029 = vmatpush3.msk.msra.mxu0 %vm120_vm12, %v2116_v22  ;;  %vm116_vm12 = vcmp.eq.s32.totalorder %v2351_v35, %v3013_v1  ;;  %v3491_v35 = vld [vmem:[#allocation17_spill] sm:$0xff] }
  0x5a   :  { %2073 = vmatpush3.msk.msra.mxu1 %vm152_vm13, %v2116_v22  ;;  %2030 = vmatprep.subr.msk.mxu0 %vm135_vm14, %v2116_v22  ;;  %vm148_vm13 = vcmp.eq.s32.totalorder %v2354_v36, %v3013_v1  ;;  %vm131_vm14 = vcmp.eq.s32.totalorder %v2357_v37, %v3013_v1  ;;  %v3492_v36 = vld [vmem:[#allocation18_spill] sm:$0xff]  ;;  %v3493_v37 = vld [vmem:[#allocation19_spill] sm:$0xff] }
  0x5b   :  { %1124 = vmatmul.mubr.f32.gmra.mxu1 %v781_v10  ;;  %2074 = vmatprep.subr.msk.mxu1 %vm167_vm15, %v2116_v22  ;;  %vm163_vm15 = vcmp.eq.s32.totalorder %v2370_v38, %v3013_v1  ;;  %v3494_v38 = vld [vmem:[#allocation20_spill] sm:$0xff]  ;;  %v1414_v9 = vld [vmem:[%s3433_s6 + $0x18] sm:$0xff]  ;;  %v1448_v10 = vld [vmem:[#allocation2] sm:$0x1] }
  0x5c   :  { %1043 = vmatprep.mubr.f32.mxu0 %v788_v11  ;;  %2031 = vmatpush3.msk.msra.mxu0 %vm119_vm0, %v2116_v22  ;;  %vm115_vm0 = vcmp.eq.s32.totalorder %v2373_v39, %v3013_v1  ;;  %v3495_v39 = vld [vmem:[#allocation21_spill] sm:$0xff] }
  0x5d   :  { %2075 = vmatpush3.msk.msra.mxu1 %vm151_vm1, %v2116_v22  ;;  %1044 = vmatmul.mubr.f32.gmra.mxu0 %v787_v12  ;;  %vm147_vm1 = vcmp.eq.s32.totalorder %v2376_v40, %v3013_v1  ;;  %v3496_v40 = vld [vmem:[#allocation22_spill] sm:$0xff] }
  0x5e   :  { %2032 = vmatprep.subr.msk.mxu0 %vm134_vm2, %v2116_v22  ;;  %2076 = vmatprep.subr.msk.mxu1 %vm166_vm3, %v2116_v22  ;;  %vm130_vm2 = vcmp.eq.s32.totalorder %v2393_v41, %v3013_v1  ;;  %vm162_vm3 = vcmp.eq.s32.totalorder %v2410_v42, %v3013_v1  ;;  %v752_v41 = vld [vmem:[%s3429_s1 + $0x8] sm:$0xff] }
  0x5f   :  { %1128 = vmatprep.mubr.f32.mxu1 %v790_v13  ;;  %2033 = vmatpush3.msk.msra.mxu0 %vm118_vm4, %v2116_v22  ;;  %vm114_vm4 = vcmp.eq.s32.totalorder %v2423_v43, %v3013_v1  ;;  %v3497_v42 = vld [vmem:[#allocation23_spill] sm:$0xff]  ;;  %v754_v43 = vld [vmem:[%s3429_s1 + $0x18] sm:$0xff] }
  0x60   :  { %2077 = vmatpush3.msk.msra.mxu1 %vm150_vm5, %v2116_v22  ;;  %2034 = vmatprep.subr.msk.mxu0 %vm133_vm6, %v2116_v22  ;;  %vm146_vm5 = vcmp.eq.s32.totalorder %v2426_v44, %v3013_v1  ;;  %vm129_vm6 = vcmp.eq.s32.totalorder %v2429_v45, %v3013_v1  ;;  %v753_v44 = vld [vmem:[%s3429_s1 + $0x10] sm:$0xff]  ;;  %v756_v45 = vld [vmem:[%s3429_s1 + $0x28] sm:$0xff] }
  0x61   :  { %1129 = vmatmul.mubr.f32.gmra.mxu1 %v789_v15  ;;  %2078 = vmatprep.subr.msk.mxu1 %vm165_vm7, %v2116_v22  ;;  %vm161_vm7 = vcmp.eq.s32.totalorder %v2442_v46, %v3013_v1  ;;  %v758_v46 = vld [vmem:[%s3429_s1 + $0x38] sm:$0xff] }
  0x62   :  { %1048 = vmatprep.mubr.f32.mxu0 %v796_v16  ;;  %2035 = vmatpush3.msk.msra.mxu0 %vm117_vm8, %v2116_v22  ;;  %vm113_vm8 = vcmp.eq.s32.totalorder %v2445_v47, %v3013_v1  ;;  %v1315_v47 = vld [vmem:[%s3430_s4] sm:$0xff] }
  0x63   :  { %2079 = vmatpush3.msk.msra.mxu1 %vm149_vm9, %v2116_v22  ;;  %1049 = vmatmul.mubr.f32.gmra.mxu0 %v795_v17  ;;  %vm145_vm9 = vcmp.eq.s32.totalorder %v2448_v48, %v3013_v1  ;;  %v1319_v48 = vld [vmem:[%s3431_s5] sm:$0xff] }
  0x64   :  { %2036 = vmatprep.subr.msk.mxu0 %vm132_vm10, %v2116_v22  ;;  %2080 = vmatprep.subr.msk.mxu1 %vm164_vm11, %v2116_v22  ;;  %vm128_vm10 = vcmp.eq.s32.totalorder %v2465_v49, %v3013_v1  ;;  %vm160_vm11 = vcmp.eq.s32.totalorder %v2482_v50, %v3013_v1  ;;  %v755_v49 = vld [vmem:[%s3429_s1 + $0x20] sm:$0xff]  ;;  %v760_v50 = vld [vmem:[%s3429_s1 + $0x48] sm:$0xff] }
  0x65   :  { %1133 = vmatprep.mubr.f32.mxu1 %v798_v18  ;;  %2037 = vmatpush3.msk.msra.mxu0 %vm116_vm12, %v2116_v22  ;;  %vm112_vm12 = vcmp.eq.s32.totalorder %v3477_v20, %v3013_v1 }
  0x66   :  { %2081 = vmatpush3.msk.msra.mxu1 %vm148_vm13, %v2116_v22  ;;  %2038 = vmatprep.subr.msk.mxu0 %vm131_vm14, %v2116_v22  ;;  %vm144_vm13 = vcmp.eq.s32.totalorder %v3478_v21, %v3013_v1  ;;  %vm127_vm14 = vcmp.eq.s32.totalorder %v3479_v23, %v3013_v1 }
  0x67   :  { %1134 = vmatmul.mubr.f32.gmra.mxu1 %v797_v19  ;;  %2082 = vmatprep.subr.msk.mxu1 %vm163_vm15, %v2116_v22  ;;  %vm159_vm15 = vcmp.eq.s32.totalorder %v3480_v24, %v3013_v1 }
  0x68   :  { %2039 = vmatpush3.msk.msra.mxu0 %vm115_vm0, %v2116_v22  ;;  %2083 = vmatpush3.msk.msra.mxu1 %vm147_vm1, %v2116_v22  ;;  %vm111_vm0 = vcmp.eq.s32.totalorder %v3481_v25, %v3013_v1  ;;  %vm143_vm1 = vcmp.eq.s32.totalorder %v3482_v26, %v3013_v1 }
  0x69   :  { %2040 = vmatprep.subr.msk.mxu0 %vm130_vm2, %v2116_v22  ;;  %2084 = vmatprep.subr.msk.mxu1 %vm162_vm3, %v2116_v22  ;;  %vm126_vm2 = vcmp.eq.s32.totalorder %v3483_v27, %v3013_v1  ;;  %vm158_vm3 = vcmp.eq.s32.totalorder %v3484_v28, %v3013_v1 }
  0x6a   :  { %2041 = vmatpush3.msk.msra.mxu0 %vm114_vm4, %v2116_v22  ;;  %2085 = vmatpush3.msk.msra.mxu1 %vm146_vm5, %v2116_v22  ;;  %vm110_vm4 = vcmp.eq.s32.totalorder %v3485_v29, %v3013_v1  ;;  %vm142_vm5 = vcmp.eq.s32.totalorder %v3486_v30, %v3013_v1 }
  0x6b   :  { %2042 = vmatprep.subr.msk.mxu0 %vm129_vm6, %v2116_v22  ;;  %2086 = vmatprep.subr.msk.mxu1 %vm161_vm7, %v2116_v22  ;;  %vm125_vm6 = vcmp.eq.s32.totalorder %v3487_v31, %v3013_v1  ;;  %vm157_vm7 = vcmp.eq.s32.totalorder %v3488_v32, %v3013_v1 }
  0x6c   :  { %2043 = vmatpush3.msk.msra.mxu0 %vm113_vm8, %v2116_v22  ;;  %2087 = vmatpush3.msk.msra.mxu1 %vm145_vm9, %v2116_v22  ;;  %vm109_vm8 = vcmp.eq.s32.totalorder %v3489_v33, %v3013_v1  ;;  %vm141_vm9 = vcmp.eq.s32.totalorder %v3490_v34, %v3013_v1 }
  0x6d   :  { %2044 = vmatprep.subr.msk.mxu0 %vm128_vm10, %v2116_v22  ;;  %2088 = vmatprep.subr.msk.mxu1 %vm160_vm11, %v2116_v22  ;;  %vm124_vm10 = vcmp.eq.s32.totalorder %v3491_v35, %v3013_v1  ;;  %vm156_vm11 = vcmp.eq.s32.totalorder %v3492_v36, %v3013_v1 }
  0x6e   :  { %2045 = vmatpush3.msk.msra.mxu0 %vm112_vm12, %v2116_v22  ;;  %2089 = vmatpush3.msk.msra.mxu1 %vm144_vm13, %v2116_v22  ;;  %vm108_vm12 = vcmp.eq.s32.totalorder %v3493_v37, %v3013_v1  ;;  %vm140_vm13 = vcmp.eq.s32.totalorder %v3494_v38, %v3013_v1 }
  0x6f   :  { %2046 = vmatprep.subr.msk.mxu0 %vm127_vm14, %v2116_v22  ;;  %2090 = vmatprep.subr.msk.mxu1 %vm159_vm15, %v2116_v22  ;;  %vm123_vm14 = vcmp.eq.s32.totalorder %v3495_v39, %v3013_v1  ;;  %vm155_vm15 = vcmp.eq.s32.totalorder %v3496_v40, %v3013_v1 }
  0x70   :  { %2047 = vmatpush3.msk.msra.mxu0 %vm111_vm0, %v2116_v22  ;;  %2091 = vmatpush3.msk.msra.mxu1 %vm143_vm1, %v2116_v22  ;;  %vm107_vm0 = vcmp.eq.s32.totalorder %v2172_v4, %v3013_v1  ;;  %vm139_vm1 = vcmp.eq.s32.totalorder %v3497_v42, %v3013_v1  ;;  %v751_v4 = vld [vmem:[%s3429_s1] sm:$0xff]  ;;  %v1312_v1 = vld [vmem:[%s3432_s3 + $0x10] sm:$0xff] }
  0x71   :  { %2048 = vmatprep.subr.msk.mxu0 %vm126_vm2, %v2116_v22  ;;  %2092 = vmatprep.subr.msk.mxu1 %vm158_vm3, %v2116_v22 }
  0x72   :  { %2049 = vmatpush3.msk.msra.mxu0 %vm110_vm4, %v2116_v22  ;;  %2093 = vmatpush3.msk.msra.mxu1 %vm142_vm5, %v2116_v22 }
  0x73   :  { %2050 = vmatprep.subr.msk.mxu0 %vm125_vm6, %v2116_v22  ;;  %2094 = vmatprep.subr.msk.mxu1 %vm157_vm7, %v2116_v22 }
  0x74   :  { %2051 = vmatpush3.msk.msra.mxu0 %vm109_vm8, %v2116_v22  ;;  %2095 = vmatpush3.msk.msra.mxu1 %vm141_vm9, %v2116_v22 }
  0x75   :  { %2052 = vmatprep.subr.msk.mxu0 %vm124_vm10, %v2116_v22  ;;  %2096 = vmatprep.subr.msk.mxu1 %vm156_vm11, %v2116_v22 }
  0x76   :  { %2053 = vmatpush3.msk.msra.mxu0 %vm108_vm12, %v2116_v22  ;;  %2097 = vmatpush3.msk.msra.mxu1 %vm140_vm13, %v2116_v22 }
  0x77   :  { %2054 = vmatprep.subr.msk.mxu0 %vm123_vm14, %v2116_v22  ;;  %2098 = vmatprep.subr.msk.mxu1 %vm155_vm15, %v2116_v22 }
  0x78   :  { %2055 = vmatpush3.msk.msra.mxu0 %vm107_vm0, %v2116_v22  ;;  %1203 = vmatprep.mubr.f32.mxu0 %v752_v41 }
  0x79   :  { %2099 = vmatpush3.msk.msra.mxu1 %vm139_vm1, %v2116_v22  ;;  %1288 = vmatprep.mubr.f32.mxu1 %v754_v43  ;;  %v757_v22 = vld [vmem:[%s3429_s1 + $0x30] sm:$0xff] }
  0x7a   :  { %1204 = vmatmul.mubr.f32.vlgmr.msra.gmra.mxu0 %v751_v4  ;;  %1289 = vmatmul.mubr.f32.vlgmr.msra.gmra.mxu1 %v753_v44 }
  0x7b   :  { %1208 = vmatprep.mubr.f32.mxu0 %v756_v45  ;;  %1293 = vmatprep.mubr.f32.mxu1 %v758_v46  ;;  %v37_v45 = vld [vmem:[%s3426_s0 + $0x2] sm:$0x1] }
  0x7c   :  { %2114 = vset.pattern.permute.xlu0 %v2117_v2  ;;  %2115 = vset.pattern.permute.xlu1 %v2117_v2  ;;  %vm1314_vm2 = vcmp.eq.s32.totalorder %v37_v45, 1  ;;  %vm1309_vm3 = vcmp.eq.s32.totalorder %v37_v45, 0 }
  0x7d   :  { %1331 = vperm.xlu0 %2114, %v1315_v47   ;;  %1351 = vperm.xlu1 %2115, %v1319_v48  }
  0x7e   :  { %1209 = vmatmul.mubr.f32.gmra.mxu0 %v755_v49  ;;  %1294 = vmatmul.mubr.f32.gmra.mxu1 %v757_v22 }
  0x7f   :  { %1213 = vmatprep.mubr.f32.mxu0 %v760_v50  ;;  %1298 = vmatprep.mubr.f32.mxu1 %v762_v5 }
  0x81   :  { %1336 = vperm.xlu0 %2114, %v1316_v57   ;;  %1356 = vperm.xlu1 %2115, %v1320_v61  }
  0x82   :  { %1214 = vmatmul.mubr.f32.gmra.mxu0 %v759_v63  ;;  %1299 = vmatmul.mubr.f32.gmra.mxu1 %v761_v0  ;;  %v1323_v0 = vsel %vm1314_vm2, 1, %v2117_v2 }
  0x83   :  { %1218 = vmatprep.mubr.f32.mxu0 %v764_v3  ;;  %1303 = vmatprep.mubr.f32.mxu1 %v766_v56 }
  0x85   :  { %1381 = vperm.xlu0 %2114, %v1310_v52   ;;  %1386 = vperm.xlu1 %2115, %v1311_v54  }
  0x86   :  { %1219 = vmatmul.mubr.f32.gmra.mxu0 %v763_v55  ;;  %1304 = vmatmul.mubr.f32.gmra.mxu1 %v765_v62 }
  0x89   :  { %1341 = vperm.xlu0 %2114, %v1317_v59   ;;  %1361 = vperm.xlu1 %2115, %v1321_v60  }
  0x8d   :  { %1391 = vperm.xlu0 %2114, %v1312_v1   ;;  %1346 = vperm.xlu1 %2115, %v1318_v53  }
  0x91   :  { %1366 = vperm.xlu0 %2114, %v1322_v51   ;;  %1396 = vperm.xlu1 %2115, %v1313_v58   ;;  %v1327_v58 = vrot.slane %v1323_v0, %v2178_v7 }
  0x93   :  { %vm3390_vm4 = vcmp.eq.s32.totalorder %v1327_v58, 1 }
  0x95   :  { %1417 = vperm.xlu0 %2114, %v1411_v14   ;;  %1422 = vperm.xlu1 %2115, %v1412_v6   ;;  %v1373_v14 = vsel %vm1309_vm3, 1, %v2117_v2 }
  0x99   :  { %1427 = vperm.xlu0 %2114, %v1413_v8   ;;  %1432 = vperm.xlu1 %2115, %v1414_v9  }
  0x9d   :  { %1451 = vperm.xlu0 %2114, %v1448_v10  }
  0xea   :  { %v1880_v11 = vpop.f32.mrf.mxu0  ;;  %v1924_v12 = vpop.f32.mrf.mxu1 }
  0xec   :  { %v1881_v13 = vpop.f32.mrf.mxu0  ;;  %v1925_v15 = vpop.f32.mrf.mxu1 }
  0xed   :  { %v1882_v46 = vadd.f32 %v1881_v13, %v1880_v11  ;;  %v1926_v47 = vadd.f32 %v1925_v15, %v1924_v12 }
  0xef   :  { %v951_v57 = vadd.f32 %v1926_v47, %v1882_v46 }
  0xf8   :  { %v3367_v33 = vpop.permute.xlu0 %1331  ;;  %v3369_v36 = vpop.permute.xlu1 %1351 }
  0xfc   :  { %v3371_v39 = vpop.permute.xlu0 %1336  ;;  %v3373_v42 = vpop.permute.xlu1 %1356 }
  0xff   :  { %v1883_v16 = vpop.f32.mrf.mxu0  ;;  %v1927_v17 = vpop.f32.mrf.mxu1 }
 0x100   :  { %v3375_v43 = vpop.permute.xlu0 %1381  ;;  %v3380_v48 = vpop.permute.xlu1 %1386 }
 0x101   :  { %v1884_v18 = vpop.f32.mrf.mxu0  ;;  %v1928_v19 = vpop.f32.mrf.mxu1 }
 0x102   :  { %v1885_v61 = vadd.f32 %v1884_v18, %v1883_v16  ;;  %v1929_v63 = vadd.f32 %v1928_v19, %v1927_v17  ;;  %v1377_v17 = vrot.slane %v1373_v14, %v2178_v7 }
 0x104   :  { %v3382_v5 = vpop.permute.xlu0 %1341  ;;  %v3385_v62 = vpop.permute.xlu1 %1361  ;;  %v956_v51 = vadd.f32 %v1929_v63, %v1885_v61  ;;  %vm3398_vm5 = vcmp.eq.s32.totalorder %v1377_v17, 1 }
 0x105   :  { %v1886_v20 = vpop.f32.mrf.mxu0  ;;  %v1930_v21 = vpop.f32.mrf.mxu1 }
 0x107   :  { %v1887_v23 = vpop.f32.mrf.mxu0  ;;  %v1931_v24 = vpop.f32.mrf.mxu1 }
 0x108   :  { %v1888_v59 = vadd.f32 %v1887_v23, %v1886_v20  ;;  %v1932_v60 = vadd.f32 %v1931_v24, %v1930_v21  ;;  %v1392_v6 = vpop.permute.xlu0 %1391  ;;  %v1347_v2 = vpop.permute.xlu1 %1346 }
 0x10a   :  { %v961_v16 = vadd.f32 %v1932_v60, %v1888_v59 }
 0x10b   :  { %v1889_v25 = vpop.f32.mrf.mxu0  ;;  %v1933_v26 = vpop.f32.mrf.mxu1 }
 0x10d   :  { %v1890_v27 = vpop.f32.mrf.mxu0  ;;  %v1934_v28 = vpop.f32.mrf.mxu1 }
 0x10e   :  { %v1891_v20 = vadd.f32 %v1890_v27, %v1889_v25  ;;  %v1935_v21 = vadd.f32 %v1934_v28, %v1933_v26  ;;  %v1369_v25 = vsel %vm3390_vm4, %v3367_v33, %v3369_v36  ;;  %v1370_v27 = vsel %vm3390_vm4, %v3371_v39, %v3373_v42  ;;  %v1397_v36 = vpop.permute.xlu1 %1396 }
 0x10f   :  { %v1399_v0 = vsel %vm3398_vm5, %v3375_v43, %v1369_v25  ;;  %v1400_v39 = vsel %vm3398_vm5, %v3380_v48, %v1370_v27  ;;  %v1371_v42 = vsel %vm3390_vm4, %v3382_v5, %v3385_v62 }
 0x110   :  { %v1401_v48 = vsel %vm3398_vm5, %v1392_v6, %v1371_v42 }
 0x111   :  { %v1968_v29 = vpop.f32.mrf.mxu0 }
 0x113   :  { %v2012_v30 = vpop.f32.mrf.mxu1  ;;  %v1969_v31 = vpop.f32.mrf.mxu0 }
 0x114   :  { %v1970_v50 = vadd.f32 %v1969_v31, %v1968_v29 }
 0x115   :  { %v2013_v32 = vpop.f32.mrf.mxu1 }
 0x116   :  { %v1036_v52 = vadd.f32 %v1970_v50, %v951_v57  ;;  %v2014_v54 = vadd.f32 %v2013_v32, %v2012_v30 }
 0x117   :  { %v1971_v34 = vpop.f32.mrf.mxu0 }
 0x118   :  { %v1121_v11 = vadd.f32 %v2014_v54, %v1036_v52 }
 0x119   :  { %v1972_v37 = vpop.f32.mrf.mxu0 }
 0x11a   :  { %v1973_v55 = vadd.f32 %v1972_v37, %v1971_v34 }
 0x11b   :  { %v2015_v35 = vpop.f32.mrf.mxu1 }
 0x11c   :  { %v1041_v12 = vadd.f32 %v1973_v55, %v956_v51 }
 0x11d   :  { %v2016_v38 = vpop.f32.mrf.mxu1  ;;  %v1974_v40 = vpop.f32.mrf.mxu0 }
 0x11e   :  { %v2017_v13 = vadd.f32 %v2016_v38, %v2015_v35  ;;  %v1367_v35 = vpop.permute.xlu0 %1366 }
 0x11f   :  { %v1975_v4 = vpop.f32.mrf.mxu0  ;;  %v1372_v14 = vsel %vm3390_vm4, %v1347_v2, %v1367_v35 }
 0x120   :  { %v1976_v8 = vadd.f32 %v1975_v4, %v1974_v40  ;;  %v1126_v34 = vadd.f32 %v2017_v13, %v1041_v12  ;;  %v966_v4 = vadd.f32 %v1935_v21, %v1891_v20 }
 0x121   :  { %v2018_v41 = vpop.f32.mrf.mxu1 }
 0x122   :  { %v1046_v29 = vadd.f32 %v1976_v8, %v961_v16  ;;  %v1418_v54 = vpop.permute.xlu0 %1417 }
 0x123   :  { %v2019_v44 = vpop.f32.mrf.mxu1  ;;  %v1977_v49 = vpop.f32.mrf.mxu0 }
 0x124   :  { %v2020_v30 = vadd.f32 %v2019_v44, %v2018_v41 }
 0x125   :  { %v1978_v3 = vpop.f32.mrf.mxu0 }
 0x126   :  { %v1979_v37 = vadd.f32 %v1978_v3, %v1977_v49  ;;  %v1131_v47 = vadd.f32 %v2020_v30, %v1046_v29  ;;  %v1428_v16 = vpop.permute.xlu0 %1427 }
 0x127   :  { %v2021_v22 = vpop.f32.mrf.mxu1 }
 0x128   :  { %v1051_v57 = vadd.f32 %v1979_v37, %v966_v4 }
 0x129   :  { %v2022_v56 = vpop.f32.mrf.mxu1 }
 0x12a   :  { %v2023_v33 = vadd.f32 %v2022_v56, %v2021_v22 }
 0x13a   :  { %v2056_v1 = vpop.f32.mrf.mxu0  ;;  %v2100_v53 = vpop.f32.mrf.mxu1 }
 0x13c   :  { %v2057_v9 = vpop.f32.mrf.mxu0  ;;  %v2101_v10 = vpop.f32.mrf.mxu1 }
 0x13d   :  { %v2058_v15 = vadd.f32 %v2057_v9, %v2056_v1  ;;  %v2102_v38 = vadd.f32 %v2101_v10, %v2100_v53  ;;  %v1136_v53 = vadd.f32 %v2023_v33, %v1051_v57  ;;  %v1423_v10 = vpop.permute.xlu1 %1422 }
 0x13e   :  { %v2059_v18 = vpop.f32.mrf.mxu0  ;;  %v2103_v19 = vpop.f32.mrf.mxu1 }
 0x13f   :  { %v1206_v24 = vadd.f32 %v2058_v15, %v1121_v11  ;;  %v1402_v15 = vsel %vm3398_vm5, %v1397_v36, %v1372_v14 }
 0x140   :  { %v2060_v31 = vpop.f32.mrf.mxu0  ;;  %v2104_v32 = vpop.f32.mrf.mxu1 }
 0x141   :  { %v2061_v40 = vadd.f32 %v2060_v31, %v2059_v18  ;;  %v1291_v44 = vadd.f32 %v2102_v38, %v1206_v24  ;;  %v2105_v46 = vadd.f32 %v2104_v32, %v2103_v19  ;;  %v1433_v21 = vpop.permute.xlu1 %1432 }
 0x142   :  { %v2062_v28 = vpop.f32.mrf.mxu0  ;;  %v2106_v41 = vpop.f32.mrf.mxu1 }
 0x143   :  { %v1211_v45 = vadd.f32 %v2061_v40, %v1126_v34  ;;  %v1403_v22 = vadd.f32 %v1399_v0, %v1291_v44  ;;  %v1452_v34 = vpop.permute.xlu0 %1451 }
 0x144   :  { %v2063_v49 = vpop.f32.mrf.mxu0  ;;  %v2107_v50 = vpop.f32.mrf.mxu1  ;;  %v1457_v37 = vrot.slane %v1452_v34, %v2178_v7 }
 0x145   :  { %v1296_v61 = vadd.f32 %v2105_v46, %v1211_v45  ;;  %v2064_v63 = vadd.f32 %v2063_v49, %v2062_v28  ;;  %v2108_v59 = vadd.f32 %v2107_v50, %v2106_v41  ;;  %v1407_v5 = vmax.f32 %v1403_v22, 0.0 }
 0x146   :  { %v2065_v3 = vpop.f32.mrf.mxu0  ;;  %v2109_v52 = vpop.f32.mrf.mxu1 }
 0x147   :  { %v1404_v56 = vadd.f32 %v1400_v39, %v1296_v61  ;;  %v1216_v55 = vadd.f32 %v2064_v63, %v1131_v47  ;;  %v1435_v17 = vmul.f32 %v1418_v54, %v1407_v5 }
 0x148   :  { %v2066_v60 = vpop.f32.mrf.mxu0  ;;  %v2110_v1 = vpop.f32.mrf.mxu1 }
 0x149   :  { %v1408_v43 = vmax.f32 %v1404_v56, 0.0  ;;  %v1301_v51 = vadd.f32 %v2108_v59, %v1216_v55  ;;  %v2067_v58 = vadd.f32 %v2066_v60, %v2065_v3  ;;  %v2111_v9 = vadd.f32 %v2110_v1, %v2109_v52 }
 0x14b   :  { %v1405_v62 = vadd.f32 %v1401_v48, %v1301_v51  ;;  %v1221_v8 = vadd.f32 %v2067_v58, %v1136_v53  ;;  %v1436_v11 = vmul.f32 %v1423_v10, %v1408_v43 }
 0x14d   :  { %v1409_v12 = vmax.f32 %v1405_v62, 0.0  ;;  %v1306_v13 = vadd.f32 %v2111_v9, %v1221_v8  ;;  %v1439_v20 = vadd.f32 %v1436_v11, %v1435_v17 }
 0x14f   :  { %v1437_v18 = vmul.f32 %v1428_v16, %v1409_v12  ;;  %v1406_v19 = vadd.f32 %v1402_v15, %v1306_v13 }
 0x151   :  { %v1410_v6 = vmax.f32 %v1406_v19, 0.0  ;;  %v1440_v23 = vadd.f32 %v1439_v20, %v1437_v18 }
 0x153   :  { %v1438_v2 = vmul.f32 %v1433_v21, %v1410_v6 }
 0x155   :  { %v1441_v24 = vadd.f32 %v1440_v23, %v1438_v2 }
 0x157   :  { %v1442_v29 = vrot.slane %v1441_v24, 4 }
 0x159   :  { %v1443_v30 = vadd.f32 %v1442_v29, %v1441_v24 }
 0x15b   :  { %v1444_v31 = vrot.slane %v1443_v30, 2 }
 0x15d   :  { %v1445_v32 = vadd.f32 %v1444_v31, %v1443_v30 }
 0x15f   :  { %v1446_v35 = vrot.slane %v1445_v32, 1 }
 0x161   :  { %v1447_v38 = vadd.f32 %v1446_v35, %v1445_v32 }
 0x163   :  { %v1458_v40 = vadd.f32 %v1457_v37, %v1447_v38 }
 0x165   :  { %1459 = vst [vmem:[%s3434_s8] sm:$0x1] %v1458_v40 }

</bundles_post_ra>
